<compile_context>
chip_gen: v7x
topology: tpu7x:2x2x1
jax: 0.10.0
libtpu: 0.0.40
codegen_flags: <defaults>
</compile_context>

<pallas_src>
import functools

import jax
import jax.numpy as jnp
import numpy as np
from jax.experimental import pallas as pl
from jax.experimental.pallas import tpu as pltpu

EPS = 1e-6  # ViT-style LayerNorm eps


def _round_up(a, m):
    return (a + m - 1) // m * m


# ----------------------------- in-kernel helpers ----------------------------
def _layernorm(z, g, b):
    mu = jnp.mean(z, axis=-1, keepdims=True)
    var = jnp.mean((z - mu) ** 2, axis=-1, keepdims=True)
    return (z - mu) * jax.lax.rsqrt(var + EPS) * g + b


def _erf(x):
    # Abramowitz & Stegun 7.1.26, |err| < 1.5e-7 -> exact (erf) GELU semantics.
    a1, a2, a3, a4, a5 = 0.254829592, -0.284496736, 1.421413741, -1.453152027, 1.061405429
    p = 0.3275911
    ax = jnp.abs(x)
    t = 1.0 / (1.0 + p * ax)
    poly = ((((a5 * t + a4) * t + a3) * t + a2) * t + a1) * t
    y = 1.0 - poly * jnp.exp(-ax * ax)
    return jnp.where(x >= 0.0, y, -y)


def _gelu_exact(x):
    return 0.5 * x * (1.0 + _erf(x * 0.7071067811865476))


# --------------------------------- kernel -----------------------------------
def aux_layer_kernel(cos_scale, n_valid,
                     x_ref,
                     g1_ref, be1_ref,
                     wq_ref, bq_ref, wk_ref, bk_ref, wv_ref, bv_ref,
                     seg_ref, expd_ref,
                     wproj_ref, bproj_ref,
                     g2_ref, be2_ref,
                     w1_ref, b1_ref, w2_ref, b2_ref,
                     gn_ref, bn_ref, whead_ref,
                     logits_ref, feat_ref):
    bf16 = jnp.bfloat16
    x = x_ref[...]                                    # (TB, Np, D) f32
    TB, Np, D = x.shape

    # CLS rows are the only rows the outputs depend on (residual stream).
    x_cls = x[:, 0, :]                                # (TB, D)

    # ---- pre-norm over all tokens (needed for K/V); reused for the CLS query ----
    h_all = _layernorm(x.reshape(TB * Np, D), g1_ref[...], be1_ref[...])
    h_bf = h_all.astype(bf16)

    # ---- K / V projections (split GEMMs; V cast to bf16 right after its bias) ----
    k = (jnp.dot(h_bf, wk_ref[...], preferred_element_type=jnp.float32)
         + bk_ref[...]).reshape(TB, Np, D)                              # f32
    v = ((jnp.dot(h_bf, wv_ref[...], preferred_element_type=jnp.float32)
          + bv_ref[...]).astype(bf16)).reshape(TB, Np, D)               # bf16

    # ---- CLS-only query; 1/sqrt(dh) already folded into wq/bq in the wrapper ----
    h_cls = h_all.reshape(TB, Np, D)[:, 0, :]
    q = jnp.dot(h_cls.astype(bf16), wq_ref[...],
                preferred_element_type=jnp.float32) + bq_ref[...]       # (TB, D)

    # ---- attention scores for ALL heads with one full-depth (D) matmul:
    #      s[b, n, h] = sum_d q[b, d] * k[b, n, d] * seg[d, h]
    t = (q[:, None, :] * k).astype(bf16)              # (TB, Np, D)  VPU multiply
    s = jnp.dot(t.reshape(TB * Np, D), seg_ref[...],
                preferred_element_type=jnp.float32).reshape(TB, Np, -1)  # (TB,Np,HP)

    # mask padded key tokens (softmax runs over the token axis = axis 1).
    # Keep this mask if token-padding rules ever change.
    if Np != n_valid:
        tok_mask = jax.lax.broadcasted_iota(jnp.int32, (1, Np, 1), 1) < n_valid
        s = jnp.where(tok_mask, s, -1e30)

    m = jnp.max(s, axis=1, keepdims=True)
    e = jnp.exp(s - m)
    denom = jnp.sum(e, axis=1, keepdims=True)
    # approx reciprocal (EUP): ~1e-3 relative deviation from exact softmax.
    p = e * pl.reciprocal(denom, approx=True)         # (TB, Np, HP)

    # ---- per-head weighted sum of V: expand probs to D lanes with one matmul,
    #      then VPU multiply + token-axis reduce (padded heads/tokens contribute 0).
    pd = jnp.dot(p.reshape(TB * Np, -1).astype(bf16), expd_ref[...],
                 preferred_element_type=jnp.float32).reshape(TB, Np, D)
    o = jnp.sum(pd * v.astype(jnp.float32), axis=1)   # (TB, D)

    # ---- single full-depth output projection + residual (LayerScale/drop_path = id) ----
    x_cls = x_cls + jnp.dot(o.astype(bf16), wproj_ref[...],
                            preferred_element_type=jnp.float32) + bproj_ref[...]

    # ---- MLP on the CLS rows only (D -> 4D -> D, exact GELU) ----
    h_m = _layernorm(x_cls, g2_ref[...], be2_ref[...])
    u = jnp.dot(h_m.astype(bf16), w1_ref[...],
                preferred_element_type=jnp.float32) + b1_ref[...]
    u = _gelu_exact(u)
    mlp_out = jnp.dot(u.astype(bf16), w2_ref[...],
                      preferred_element_type=jnp.float32) + b2_ref[...]
    x_cls = x_cls + mlp_out

    # ---- self.norm (fc_norm is Identity for global_pool='token'); head_drop = id ----
    feat = _layernorm(x_cls, gn_ref[...], bn_ref[...])                  # (TB, D)

    # lane-dense feat store (pad to 128-lane slab when D is not a lane multiple)
    Dp = feat_ref.shape[-1]
    if Dp != D:
        feat_ref[...] = jnp.concatenate(
            [feat, jnp.zeros((TB, Dp - D), feat.dtype)], axis=-1)
    else:
        feat_ref[...] = feat

    # ---- CosNorm_Classifier head (weight pre-normalized/transposed/padded; f32 GEMM) ----
    nx = jnp.sqrt(jnp.sum(feat * feat, axis=-1, keepdims=True))
    ex = feat / (1.0 + nx)                            # (norm/(1+norm)) * x/norm
    logits_ref[...] = cos_scale * jnp.dot(ex, whead_ref[...],
                                          preferred_element_type=jnp.float32)


# ------------------- Buffered(1) feature probe (narrow check) ----------------
@functools.lru_cache(maxsize=1)
def _buffered_weights_supported():
    """Tiny probe kernel: does this Pallas build accept pl.Buffered(1) single-buffered
    resident weight blocks?  Narrow check -- never wraps the real kernel execution."""
    try:
        spec = pl.BlockSpec((8, 128), lambda i: (0, 0), pipeline_mode=pl.Buffered(1))

        def _probe(w_ref, o_ref):
            o_ref[...] = w_ref[...] + 1.0

        out = pl.pallas_call(
            _probe,
            grid=(2,),
            in_specs=[spec],
            out_specs=pl.BlockSpec((8, 128), lambda i: (0, 0)),
            out_shape=jax.ShapeDtypeStruct((8, 128), jnp.float32),
        )(jnp.zeros((8, 128), jnp.float32))
        jax.block_until_ready(out)
        return True
    except Exception:
        return False


# -------------------------------- wrapper ------------------------------------
def aux_layer_forward(x, params, *, num_heads, cos_scale=30.0, tb=None):
    f32, bf16 = jnp.float32, jnp.bfloat16
    # TODO(synk): on v5e, keeping x in bf16 in HBM (upcast in-kernel) would halve
    # the streamed bytes; kept f32 here for exact LN / residual-stream math.
    x = x.astype(f32)
    B, N, D = x.shape
    C = params["w_head"].shape[0]
    dh = D // num_heads

    N_pad = _round_up(N, 8)
    C_pad = _round_up(C, 128)
    D_out = D if D % 128 == 0 else _round_up(D, 128)
    HP = _round_up(num_heads, 8)

    # ---- one-time weight preprocessing (outside the kernel) ----
    scale = 1.0 / float(dh) ** 0.5
    w_qkv = params["w_qkv"].astype(f32)
    b_qkv = params["b_qkv"].astype(f32).reshape(1, -1)
    w_q = (w_qkv[:, :D] * scale).astype(bf16)        # fold 1/sqrt(dh) into Q
    b_q = (b_qkv[:, :D] * scale).astype(f32)
    w_k = w_qkv[:, D:2 * D].astype(bf16)
    b_k = b_qkv[:, D:2 * D]
    w_v = w_qkv[:, 2 * D:].astype(bf16)
    b_v = b_qkv[:, 2 * D:]

    # block-diagonal segment-sum matrix (D, HP) and its expand transpose (HP, D)
    seg_np = np.zeros((D, HP), np.float32)
    for h in range(num_heads):
        seg_np[h * dh:(h + 1) * dh, h] = 1.0
    seg = jnp.asarray(seg_np, dtype=bf16)
    expd = jnp.asarray(seg_np.T, dtype=bf16)

    # CosNorm head: normalize rows once, transpose to (D, C), pad C to lane width.
    wh = params["w_head"].astype(f32)
    ewt = (wh / jnp.sqrt(jnp.sum(wh * wh, axis=-1, keepdims=True))).T   # (D, C)
    if C_pad != C:
        ewt = jnp.pad(ewt, ((0, 0), (0, C_pad - C)))

    weights = (
        params["g1"].astype(f32).reshape(1, D), params["be1"].astype(f32).reshape(1, D),
        w_q, b_q, w_k, b_k, w_v, b_v,
        seg, expd,
        params["w_proj"].astype(bf16), params["b_proj"].astype(f32).reshape(1, D),
        params["g2"].astype(f32).reshape(1, D), params["be2"].astype(f32).reshape(1, D),
        params["w1"].astype(bf16), params["b1"].astype(f32).reshape(1, -1),
        params["w2"].astype(bf16), params["b2"].astype(f32).reshape(1, D),
        params["gn"].astype(f32).reshape(1, D), params["bn"].astype(f32).reshape(1, D),
        ewt,
    )

    # ---- generation-aware batch tiling & VMEM budget ----
    try:
        vmem_cap = int(pltpu.get_tpu_info().vmem_capacity_bytes)
    except Exception:
        vmem_cap = 64 << 20                          # v7x per-TensorCore VMEM (smallest)
    single_buf = _buffered_weights_supported()
    weight_bytes = sum(int(w.size) * np.dtype(w.dtype).itemsize for w in weights)
    weight_resident = weight_bytes * (1 if single_buf else 2)

    # live bytes per batch row: x (f32, double-buffered), h_all/t (f32), k (f32),
    # v (bf16), pd (f32), scores/probs (>=128 lanes), outputs (double-buffered).
    per_row = (N_pad * D * (4 * 2 + 4 + 4 + 2 + 4)
               + N_pad * max(HP, 128) * 4 * 2
               + (C_pad + D_out) * 4 * 2)
    budget = int(vmem_cap * 0.7) - weight_resident - (2 << 20)
    tb_cap = max(8, min(64, (budget // max(per_row, 1)) // 8 * 8))
    TB = min(_round_up(tb, 8) if tb is not None else 32, tb_cap)
    TB = min(TB, _round_up(B, 8))
    B_pad = _round_up(B, TB)
    if B_pad // TB < 2 and B_pad >= 16:
        # v7x has 2 TensorCores: keep >= 2 "parallel" grid steps when batch allows.
        TB = max(8, (B_pad // 2) // 8 * 8)
        B_pad = _round_up(B, TB)

    if B_pad != B or N_pad != N:
        x = jnp.pad(x, ((0, B_pad - B), (0, N_pad - N), (0, 0)))

    vmem_limit = int(min(int(vmem_cap * 0.9),
                         max(32 << 20, weight_resident + TB * per_row + (4 << 20))))

    kernel = functools.partial(aux_layer_kernel, float(cos_scale), N)

    def weight_spec(shape):
        idx = lambda b: (0,) * len(shape)
        if single_buf:
            # constant index_map + single buffer -> weights stay resident across steps
            return pl.BlockSpec(shape, idx, pipeline_mode=pl.Buffered(1))
        return pl.BlockSpec(shape, idx)

    in_specs = [pl.BlockSpec((TB, N_pad, D), lambda b: (b, 0, 0))]
    in_specs += [weight_spec(tuple(w.shape)) for w in weights]
    out_specs = (pl.BlockSpec((TB, C_pad), lambda b: (b, 0)),
                 pl.BlockSpec((TB, D_out), lambda b: (b, 0)))
    out_shape = (jax.ShapeDtypeStruct((B_pad, C_pad), f32),
                 jax.ShapeDtypeStruct((B_pad, D_out), f32))

    logits, feat = pl.pallas_call(
        kernel,
        grid=(B_pad // TB,),
        in_specs=in_specs,
        out_specs=out_specs,
        out_shape=out_shape,
        compiler_params=pltpu.CompilerParams(
            dimension_semantics=("parallel",),
            vmem_limit_bytes=vmem_limit),
    )(x, *weights)

    return logits[:B, :C], feat[:B, :D]


# ----------------------------- pure-JAX reference ----------------------------
def reference(x, params, *, num_heads, cos_scale=30.0):
    def ln(z, g, b):
        mu = z.mean(-1, keepdims=True)
        var = ((z - mu) ** 2).mean(-1, keepdims=True)
        return (z - mu) / jnp.sqrt(var + EPS) * g + b

    B, N, D = x.shape
    dh = D // num_heads
    h = ln(x, params["g1"][0], params["be1"][0])
    qkv = h @ params["w_qkv"] + params["b_qkv"][0]
    q, k, v = qkv[..., :D], qkv[..., D:2 * D], qkv[..., 2 * D:]
    q = q.reshape(B, N, num_heads, dh).transpose(0, 2, 1, 3)
    k = k.reshape(B, N, num_heads, dh).transpose(0, 2, 1, 3)
    v = v.reshape(B, N, num_heads, dh).transpose(0, 2, 1, 3)
    s = jnp.einsum("bhnd,bhmd->bhnm", q, k) / jnp.sqrt(float(dh))
    p = jax.nn.softmax(s, axis=-1)
    o = jnp.einsum("bhnm,bhmd->bhnd", p, v).transpose(0, 2, 1, 3).reshape(B, N, D)
    x = x + o @ params["w_proj"] + params["b_proj"][0]
    h = ln(x, params["g2"][0], params["be2"][0])
    h = jax.nn.gelu(h @ params["w1"] + params["b1"][0], approximate=False)
    x = x + h @ params["w2"] + params["b2"][0]
    x = ln(x, params["gn"][0], params["bn"][0])
    cls = x[:, 0]
    nx = jnp.linalg.norm(cls, axis=-1, keepdims=True)
    ex = cls / (1.0 + nx)
    w = params["w_head"]
    ew = w / jnp.linalg.norm(w, axis=-1, keepdims=True)
    return cos_scale * ex @ ew.T, cls


# ----------------------------------- main ------------------------------------
if __name__ == "__main__":
    # small shapes consistent with the module: (B, seq, embed_dim)
    B, N, D, H, C = 2, 8, 32, 4, 16
    Dh = int(D * 4.0)          # mlp_ratio = 4.0
    SCALE = 30.0               # CosNorm scale

    key = jax.random.PRNGKey(0)
    ks = jax.random.split(key, 16)
    nrm = lambda k, shape, s=0.02: jax.random.normal(k, shape, jnp.float32) * s

    params = dict(
        g1=1.0 + nrm(ks[0], (1, D)),  be1=nrm(ks[1], (1, D)),
        w_qkv=nrm(ks[2], (D, 3 * D)), b_qkv=nrm(ks[3], (1, 3 * D)),
        w_proj=nrm(ks[4], (D, D)),    b_proj=nrm(ks[5], (1, D)),
        g2=1.0 + nrm(ks[6], (1, D)),  be2=nrm(ks[7], (1, D)),
        w1=nrm(ks[8], (D, Dh)),       b1=nrm(ks[9], (1, Dh)),
        w2=nrm(ks[10], (Dh, D)),      b2=nrm(ks[11], (1, D)),
        gn=1.0 + nrm(ks[12], (1, D)), bn=nrm(ks[13], (1, D)),
        w_head=nrm(ks[14], (C, D), 0.1),
    )
    x = jax.random.normal(ks[15], (B, N, D), jnp.float32)

    logits, feat = aux_layer_forward(x, params, num_heads=H, cos_scale=SCALE)
    jax.block_until_ready((logits, feat))

    ref_logits, ref_feat = reference(x, params, num_heads=H, cos_scale=SCALE)
    # bf16 MXU operands (f32 accumulation) -> relaxed tolerance vs the f32 reference
    err_l = float(np.max(np.abs(np.asarray(logits) - np.asarray(ref_logits))))
    err_f = float(np.max(np.abs(np.asarray(feat) - np.asarray(ref_feat))))
    assert np.allclose(np.asarray(logits), np.asarray(ref_logits),
                       rtol=2e-2, atol=2e-2), f"logits mismatch, max abs err {err_l}"
    assert np.allclose(np.asarray(feat), np.asarray(ref_feat),
                       rtol=2e-2, atol=2e-2), f"feat mismatch, max abs err {err_f}"

    # TODO(synk): dropout / drop_path / head_drop and the attn_pool('map') / 'avg'
    # pooling branches are identity or unused for the default eval config
    # (global_pool='token'), so they are not emitted.
    print("KERNEL_OK")
</pallas_src>

<mosaic_0001>
module attributes {stable_mosaic.version = 11 : i64} {
  func.func @_probe(%arg0: i32, %arg1: memref<8x128xf32, #tpu.memory_space<vmem>>, %arg2: memref<8x128xf32, #tpu.memory_space<vmem>>) attributes {dimension_semantics = [#tpu.dimension_semantics<arbitrary>], iteration_bounds = array<i64: 2>, scalar_prefetch = 0 : i64, scratch_operands = 0 : i64, tpu.core_type = #tpu.core_type<tc>, window_params = [{pipeline_mode = #tpu.pipeline_mode<synchronous>, transform_indices = @transform_0, window_bounds = array<i64: 8, 128>}, {pipeline_mode = #tpu.pipeline_mode<synchronous>, transform_indices = @transform_1, window_bounds = array<i64: 8, 128>}]} {
    %c0 = arith.constant 0 : index
    %c0_0 = arith.constant 0 : index
    %0 = vector.load %arg1[%c0, %c0_0] : memref<8x128xf32, #tpu.memory_space<vmem>>, vector<8x128xf32>
    %cst = arith.constant 1.000000e+00 : f32
    %1 = vector.broadcast %cst : f32 to vector<8x128xf32>
    %2 = arith.addf %0, %1 : vector<8x128xf32>
    %c0_1 = arith.constant 0 : index
    %c0_2 = arith.constant 0 : index
    %3 = vector.load %arg2[%c0_1, %c0_2] : memref<8x128xf32, #tpu.memory_space<vmem>>, vector<8x128xf32>
    tpu.vector_store %arg2[%c0_1, %c0_2], %2 {strides = array<i32>} : memref<8x128xf32, #tpu.memory_space<vmem>>, vector<8x128xf32>,
    return
  }
  func.func @transform_0(%arg0: i32) -> (i32, i32) {
    %c0_i32 = arith.constant 0 : i32
    %c0_i32_0 = arith.constant 0 : i32
    %c0_i32_1 = arith.constant 0 : i32
    return %c0_i32, %c0_i32_0 : i32, i32
  }
  func.func @transform_1(%arg0: i32) -> (i32, i32) {
    %c0_i32 = arith.constant 0 : i32
    %c0_i32_0 = arith.constant 0 : i32
    %c0_i32_1 = arith.constant 0 : i32
    return %c0_i32, %c0_i32_0 : i32, i32
  }
}

module attributes {stable_mosaic.version = 11 : i64} {
  func.func @aux_layer_kernel(%arg0: i32, %arg1: memref<8x8x32xf32, #tpu.memory_space<vmem>>, %arg2: memref<1x32xf32, #tpu.memory_space<vmem>>, %arg3: memref<1x32xf32, #tpu.memory_space<vmem>>, %arg4: memref<32x32xbf16, #tpu.memory_space<vmem>>, %arg5: memref<1x32xf32, #tpu.memory_space<vmem>>, %arg6: memref<32x32xbf16, #tpu.memory_space<vmem>>, %arg7: memref<1x32xf32, #tpu.memory_space<vmem>>, %arg8: memref<32x32xbf16, #tpu.memory_space<vmem>>, %arg9: memref<1x32xf32, #tpu.memory_space<vmem>>, %arg10: memref<32x8xbf16, #tpu.memory_space<vmem>>, %arg11: memref<8x32xbf16, #tpu.memory_space<vmem>>, %arg12: memref<32x32xbf16, #tpu.memory_space<vmem>>, %arg13: memref<1x32xf32, #tpu.memory_space<vmem>>, %arg14: memref<1x32xf32, #tpu.memory_space<vmem>>, %arg15: memref<1x32xf32, #tpu.memory_space<vmem>>, %arg16: memref<32x128xbf16, #tpu.memory_space<vmem>>, %arg17: memref<1x128xf32, #tpu.memory_space<vmem>>, %arg18: memref<128x32xbf16, #tpu.memory_space<vmem>>, %arg19: memref<1x32xf32, #tpu.memory_space<vmem>>, %arg20: memref<1x32xf32, #tpu.memory_space<vmem>>, %arg21: memref<1x32xf32, #tpu.memory_space<vmem>>, %arg22: memref<32x128xf32, #tpu.memory_space<vmem>>, %arg23: memref<8x128xf32, #tpu.memory_space<vmem>>, %arg24: memref<8x128xf32, #tpu.memory_space<vmem>>) attributes {dimension_semantics = [#tpu.dimension_semantics<parallel>], iteration_bounds = array<i64: 1>, scalar_prefetch = 0 : i64, scratch_operands = 0 : i64, tpu.core_type = #tpu.core_type<tc>, window_params = [{transform_indices = @transform_0, window_bounds = array<i64: 8, 8, 32>}, {pipeline_mode = #tpu.pipeline_mode<synchronous>, transform_indices = @transform_1, window_bounds = array<i64: 1, 32>}, {pipeline_mode = #tpu.pipeline_mode<synchronous>, transform_indices = @transform_2, window_bounds = array<i64: 1, 32>}, {pipeline_mode = #tpu.pipeline_mode<synchronous>, transform_indices = @transform_3, window_bounds = array<i64: 32, 32>}, {pipeline_mode = #tpu.pipeline_mode<synchronous>, transform_indices = @transform_4, window_bounds = array<i64: 1, 32>}, {pipeline_mode = #tpu.pipeline_mode<synchronous>, transform_indices = @transform_5, window_bounds = array<i64: 32, 32>}, {pipeline_mode = #tpu.pipeline_mode<synchronous>, transform_indices = @transform_6, window_bounds = array<i64: 1, 32>}, {pipeline_mode = #tpu.pipeline_mode<synchronous>, transform_indices = @transform_7, window_bounds = array<i64: 32, 32>}, {pipeline_mode = #tpu.pipeline_mode<synchronous>, transform_indices = @transform_8, window_bounds = array<i64: 1, 32>}, {pipeline_mode = #tpu.pipeline_mode<synchronous>, transform_indices = @transform_9, window_bounds = array<i64: 32, 8>}, {pipeline_mode = #tpu.pipeline_mode<synchronous>, transform_indices = @transform_10, window_bounds = array<i64: 8, 32>}, {pipeline_mode = #tpu.pipeline_mode<synchronous>, transform_indices = @transform_11, window_bounds = array<i64: 32, 32>}, {pipeline_mode = #tpu.pipeline_mode<synchronous>, transform_indices = @transform_12, window_bounds = array<i64: 1, 32>}, {pipeline_mode = #tpu.pipeline_mode<synchronous>, transform_indices = @transform_13, window_bounds = array<i64: 1, 32>}, {pipeline_mode = #tpu.pipeline_mode<synchronous>, transform_indices = @transform_14, window_bounds = array<i64: 1, 32>}, {pipeline_mode = #tpu.pipeline_mode<synchronous>, transform_indices = @transform_15, window_bounds = array<i64: 32, 128>}, {pipeline_mode = #tpu.pipeline_mode<synchronous>, transform_indices = @transform_16, window_bounds = array<i64: 1, 128>}, {pipeline_mode = #tpu.pipeline_mode<synchronous>, transform_indices = @transform_17, window_bounds = array<i64: 128, 32>}, {pipeline_mode = #tpu.pipeline_mode<synchronous>, transform_indices = @transform_18, window_bounds = array<i64: 1, 32>}, {pipeline_mode = #tpu.pipeline_mode<synchronous>, transform_indices = @transform_19, window_bounds = array<i64: 1, 32>}, {pipeline_mode = #tpu.pipeline_mode<synchronous>, transform_indices = @transform_20, window_bounds = array<i64: 1, 32>}, {pipeline_mode = #tpu.pipeline_mode<synchronous>, transform_indices = @transform_21, window_bounds = array<i64: 32, 128>}, {transform_indices = @transform_22, window_bounds = array<i64: 8, 128>}, {transform_indices = @transform_23, window_bounds = array<i64: 8, 128>}]} {
    %c0 = arith.constant 0 : index
    %c0_0 = arith.constant 0 : index
    %c0_1 = arith.constant 0 : index
    %0 = vector.load %arg1[%c0, %c0_0, %c0_1] : memref<8x8x32xf32, #tpu.memory_space<vmem>>, vector<8x8x32xf32>
    %1 = vector.extract_strided_slice %0 {offsets = [0, 0, 0], sizes = [8, 1, 32], strides = [1, 1, 1]} : vector<8x8x32xf32> to vector<8x1x32xf32>
    %2 = vector.shape_cast %1 : vector<8x1x32xf32> to vector<8x32xf32>
    %3 = vector.shape_cast %0 : vector<8x8x32xf32> to vector<64x32xf32>
    %c0_2 = arith.constant 0 : index
    %c0_3 = arith.constant 0 : index
    %4 = vector.load %arg2[%c0_2, %c0_3] : memref<1x32xf32, #tpu.memory_space<vmem>>, vector<1x32xf32>
    %c0_4 = arith.constant 0 : index
    %c0_5 = arith.constant 0 : index
    %5 = vector.load %arg3[%c0_4, %c0_5] : memref<1x32xf32, #tpu.memory_space<vmem>>, vector<1x32xf32>
    %cst = arith.constant dense<0.000000e+00> : vector<64xf32>
    %6 = vector.multi_reduction <add>, %3, %cst [1] : vector<64x32xf32> to vector<64xf32>
    %7 = vector.shape_cast %6 : vector<64xf32> to vector<64x1xf32>
    %cst_6 = arith.constant 3.200000e+01 : f32
    %8 = vector.broadcast %cst_6 : f32 to vector<64x1xf32>
    %9 = arith.divf %7, %8 : vector<64x1xf32>
    %10 = vector.broadcast %9 : vector<64x1xf32> to vector<64x32xf32>
    %11 = arith.subf %3, %10 : vector<64x32xf32>
    %12 = arith.mulf %11, %11 : vector<64x32xf32>
    %cst_7 = arith.constant dense<0.000000e+00> : vector<64xf32>
    %13 = vector.multi_reduction <add>, %12, %cst_7 [1] : vector<64x32xf32> to vector<64xf32>
    %14 = vector.shape_cast %13 : vector<64xf32> to vector<64x1xf32>
    %cst_8 = arith.constant 3.200000e+01 : f32
    %15 = vector.broadcast %cst_8 : f32 to vector<64x1xf32>
    %16 = arith.divf %14, %15 : vector<64x1xf32>
    %17 = vector.broadcast %9 : vector<64x1xf32> to vector<64x32xf32>
    %18 = arith.subf %3, %17 : vector<64x32xf32>
    %cst_9 = arith.constant 9.99999997E-7 : f32
    %19 = vector.broadcast %cst_9 : f32 to vector<64x1xf32>
    %20 = arith.addf %16, %19 : vector<64x1xf32>
    %21 = math.rsqrt %20 : vector<64x1xf32>
    %22 = vector.broadcast %21 : vector<64x1xf32> to vector<64x32xf32>
    %23 = arith.mulf %18, %22 : vector<64x32xf32>
    %24 = vector.broadcast %4 : vector<1x32xf32> to vector<64x32xf32>
    %25 = arith.mulf %23, %24 : vector<64x32xf32>
    %26 = vector.broadcast %5 : vector<1x32xf32> to vector<64x32xf32>
    %27 = arith.addf %25, %26 : vector<64x32xf32>
    %28 = arith.truncf %27 : vector<64x32xf32> to vector<64x32xbf16>
    %c0_10 = arith.constant 0 : index
    %c0_11 = arith.constant 0 : index
    %29 = vector.load %arg6[%c0_10, %c0_11] : memref<32x32xbf16, #tpu.memory_space<vmem>>, vector<32x32xbf16>
    %cst_12 = arith.constant dense<0.000000e+00> : vector<64x32xf32>
    %30 = tpu.matmul %28, %29, %cst_12 {dimension_numbers = #tpu.dot_dimension_numbers<[1], [0], [0], [1], [0, 0, 1, 1], [], []>} : vector<64x32xbf16>, vector<32x32xbf16>, vector<64x32xf32> -> vector<64x32xf32>
    %c0_13 = arith.constant 0 : index
    %c0_14 = arith.constant 0 : index
    %31 = vector.load %arg7[%c0_13, %c0_14] : memref<1x32xf32, #tpu.memory_space<vmem>>, vector<1x32xf32>
    %32 = vector.broadcast %31 : vector<1x32xf32> to vector<64x32xf32>
    %33 = arith.addf %30, %32 : vector<64x32xf32>
    %34 = vector.shape_cast %33 : vector<64x32xf32> to vector<8x8x32xf32>
    %c0_15 = arith.constant 0 : index
    %c0_16 = arith.constant 0 : index
    %35 = vector.load %arg8[%c0_15, %c0_16] : memref<32x32xbf16, #tpu.memory_space<vmem>>, vector<32x32xbf16>
    %cst_17 = arith.constant dense<0.000000e+00> : vector<64x32xf32>
    %36 = tpu.matmul %28, %35, %cst_17 {dimension_numbers = #tpu.dot_dimension_numbers<[1], [0], [0], [1], [0, 0, 1, 1], [], []>} : vector<64x32xbf16>, vector<32x32xbf16>, vector<64x32xf32> -> vector<64x32xf32>
    %c0_18 = arith.constant 0 : index
    %c0_19 = arith.constant 0 : index
    %37 = vector.load %arg9[%c0_18, %c0_19] : memref<1x32xf32, #tpu.memory_space<vmem>>, vector<1x32xf32>
    %38 = vector.broadcast %37 : vector<1x32xf32> to vector<64x32xf32>
    %39 = arith.addf %36, %38 : vector<64x32xf32>
    %40 = arith.truncf %39 : vector<64x32xf32> to vector<64x32xbf16>
    %41 = vector.shape_cast %40 : vector<64x32xbf16> to vector<8x8x32xbf16>
    %42 = vector.shape_cast %27 : vector<64x32xf32> to vector<8x8x32xf32>
    %43 = vector.extract_strided_slice %42 {offsets = [0, 0, 0], sizes = [8, 1, 32], strides = [1, 1, 1]} : vector<8x8x32xf32> to vector<8x1x32xf32>
    %44 = vector.shape_cast %43 : vector<8x1x32xf32> to vector<8x32xf32>
    %45 = arith.truncf %44 : vector<8x32xf32> to vector<8x32xbf16>
    %c0_20 = arith.constant 0 : index
    %c0_21 = arith.constant 0 : index
    %46 = vector.load %arg4[%c0_20, %c0_21] : memref<32x32xbf16, #tpu.memory_space<vmem>>, vector<32x32xbf16>
    %cst_22 = arith.constant dense<0.000000e+00> : vector<8x32xf32>
    %47 = tpu.matmul %45, %46, %cst_22 {dimension_numbers = #tpu.dot_dimension_numbers<[1], [0], [0], [1], [0, 0, 1, 1], [], []>} : vector<8x32xbf16>, vector<32x32xbf16>, vector<8x32xf32> -> vector<8x32xf32>
    %c0_23 = arith.constant 0 : index
    %c0_24 = arith.constant 0 : index
    %48 = vector.load %arg5[%c0_23, %c0_24] : memref<1x32xf32, #tpu.memory_space<vmem>>, vector<1x32xf32>
    %49 = vector.broadcast %48 : vector<1x32xf32> to vector<8x32xf32>
    %50 = arith.addf %47, %49 : vector<8x32xf32>
    %51 = vector.shape_cast %50 : vector<8x32xf32> to vector<8x1x32xf32>
    %52 = vector.broadcast %51 : vector<8x1x32xf32> to vector<8x8x32xf32>
    %53 = arith.mulf %52, %34 : vector<8x8x32xf32>
    %54 = arith.truncf %53 : vector<8x8x32xf32> to vector<8x8x32xbf16>
    %55 = vector.shape_cast %54 : vector<8x8x32xbf16> to vector<64x32xbf16>
    %c0_25 = arith.constant 0 : index
    %c0_26 = arith.constant 0 : index
    %56 = vector.load %arg10[%c0_25, %c0_26] : memref<32x8xbf16, #tpu.memory_space<vmem>>, vector<32x8xbf16>
    %cst_27 = arith.constant dense<0.000000e+00> : vector<64x8xf32>
    %57 = tpu.matmul %55, %56, %cst_27 {dimension_numbers = #tpu.dot_dimension_numbers<[1], [0], [0], [1], [0, 0, 1, 1], [], []>} : vector<64x32xbf16>, vector<32x8xbf16>, vector<64x8xf32> -> vector<64x8xf32>
    %58 = vector.shape_cast %57 : vector<64x8xf32> to vector<8x8x8xf32>
    %cst_28 = arith.constant dense<0xFF800000> : vector<8x8xf32>
    %59 = vector.multi_reduction <maximumf>, %58, %cst_28 [1] : vector<8x8x8xf32> to vector<8x8xf32>
    %60 = vector.shape_cast %59 : vector<8x8xf32> to vector<8x1x8xf32>
    %61 = vector.broadcast %60 : vector<8x1x8xf32> to vector<8x8x8xf32>
    %62 = arith.subf %58, %61 : vector<8x8x8xf32>
    %63 = math.exp %62 : vector<8x8x8xf32>
    %cst_29 = arith.constant dense<0.000000e+00> : vector<8x8xf32>
    %64 = vector.multi_reduction <add>, %63, %cst_29 [1] : vector<8x8x8xf32> to vector<8x8xf32>
    %65 = vector.shape_cast %64 : vector<8x8xf32> to vector<8x1x8xf32>
    %66 = tpu.reciprocal %65 {approx = true} : vector<8x1x8xf32> -> vector<8x1x8xf32>
    %67 = vector.broadcast %66 : vector<8x1x8xf32> to vector<8x8x8xf32>
    %68 = arith.mulf %63, %67 : vector<8x8x8xf32>
    %69 = vector.shape_cast %68 : vector<8x8x8xf32> to vector<64x8xf32>
    %70 = arith.truncf %69 : vector<64x8xf32> to vector<64x8xbf16>
    %c0_30 = arith.constant 0 : index
    %c0_31 = arith.constant 0 : index
    %71 = vector.load %arg11[%c0_30, %c0_31] : memref<8x32xbf16, #tpu.memory_space<vmem>>, vector<8x32xbf16>
    %cst_32 = arith.constant dense<0.000000e+00> : vector<64x32xf32>
    %72 = tpu.matmul %70, %71, %cst_32 {dimension_numbers = #tpu.dot_dimension_numbers<[1], [0], [0], [1], [0, 0, 1, 1], [], []>} : vector<64x8xbf16>, vector<8x32xbf16>, vector<64x32xf32> -> vector<64x32xf32>
    %73 = vector.shape_cast %72 : vector<64x32xf32> to vector<8x8x32xf32>
    %74 = arith.extf %41 : vector<8x8x32xbf16> to vector<8x8x32xf32>
    %75 = arith.mulf %73, %74 : vector<8x8x32xf32>
    %cst_33 = arith.constant dense<0.000000e+00> : vector<8x32xf32>
    %76 = vector.multi_reduction <add>, %75, %cst_33 [1] : vector<8x8x32xf32> to vector<8x32xf32>
    %77 = arith.truncf %76 : vector<8x32xf32> to vector<8x32xbf16>
    %c0_34 = arith.constant 0 : index
    %c0_35 = arith.constant 0 : index
    %78 = vector.load %arg12[%c0_34, %c0_35] : memref<32x32xbf16, #tpu.memory_space<vmem>>, vector<32x32xbf16>
    %cst_36 = arith.constant dense<0.000000e+00> : vector<8x32xf32>
    %79 = tpu.matmul %77, %78, %cst_36 {dimension_numbers = #tpu.dot_dimension_numbers<[1], [0], [0], [1], [0, 0, 1, 1], [], []>} : vector<8x32xbf16>, vector<32x32xbf16>, vector<8x32xf32> -> vector<8x32xf32>
    %80 = arith.addf %2, %79 : vector<8x32xf32>
    %c0_37 = arith.constant 0 : index
    %c0_38 = arith.constant 0 : index
    %81 = vector.load %arg13[%c0_37, %c0_38] : memref<1x32xf32, #tpu.memory_space<vmem>>, vector<1x32xf32>
    %82 = vector.broadcast %81 : vector<1x32xf32> to vector<8x32xf32>
    %83 = arith.addf %80, %82 : vector<8x32xf32>
    %c0_39 = arith.constant 0 : index
    %c0_40 = arith.constant 0 : index
    %84 = vector.load %arg14[%c0_39, %c0_40] : memref<1x32xf32, #tpu.memory_space<vmem>>, vector<1x32xf32>
    %c0_41 = arith.constant 0 : index
    %c0_42 = arith.constant 0 : index
    %85 = vector.load %arg15[%c0_41, %c0_42] : memref<1x32xf32, #tpu.memory_space<vmem>>, vector<1x32xf32>
    %cst_43 = arith.constant dense<0.000000e+00> : vector<8xf32>
    %86 = vector.multi_reduction <add>, %83, %cst_43 [1] : vector<8x32xf32> to vector<8xf32>
    %87 = vector.shape_cast %86 : vector<8xf32> to vector<8x1xf32>
    %cst_44 = arith.constant 3.200000e+01 : f32
    %88 = vector.broadcast %cst_44 : f32 to vector<8x1xf32>
    %89 = arith.divf %87, %88 : vector<8x1xf32>
    %90 = vector.broadcast %89 : vector<8x1xf32> to vector<8x32xf32>
    %91 = arith.subf %83, %90 : vector<8x32xf32>
    %92 = arith.mulf %91, %91 : vector<8x32xf32>
    %cst_45 = arith.constant dense<0.000000e+00> : vector<8xf32>
    %93 = vector.multi_reduction <add>, %92, %cst_45 [1] : vector<8x32xf32> to vector<8xf32>
    %94 = vector.shape_cast %93 : vector<8xf32> to vector<8x1xf32>
    %cst_46 = arith.constant 3.200000e+01 : f32
    %95 = vector.broadcast %cst_46 : f32 to vector<8x1xf32>
    %96 = arith.divf %94, %95 : vector<8x1xf32>
    %97 = vector.broadcast %89 : vector<8x1xf32> to vector<8x32xf32>
    %98 = arith.subf %83, %97 : vector<8x32xf32>
    %cst_47 = arith.constant 9.99999997E-7 : f32
    %99 = vector.broadcast %cst_47 : f32 to vector<8x1xf32>
    %100 = arith.addf %96, %99 : vector<8x1xf32>
    %101 = math.rsqrt %100 : vector<8x1xf32>
    %102 = vector.broadcast %101 : vector<8x1xf32> to vector<8x32xf32>
    %103 = arith.mulf %98, %102 : vector<8x32xf32>
    %104 = vector.broadcast %84 : vector<1x32xf32> to vector<8x32xf32>
    %105 = arith.mulf %103, %104 : vector<8x32xf32>
    %106 = vector.broadcast %85 : vector<1x32xf32> to vector<8x32xf32>
    %107 = arith.addf %105, %106 : vector<8x32xf32>
    %108 = arith.truncf %107 : vector<8x32xf32> to vector<8x32xbf16>
    %c0_48 = arith.constant 0 : index
    %c0_49 = arith.constant 0 : index
    %109 = vector.load %arg16[%c0_48, %c0_49] : memref<32x128xbf16, #tpu.memory_space<vmem>>, vector<32x128xbf16>
    %cst_50 = arith.constant dense<0.000000e+00> : vector<8x128xf32>
    %110 = tpu.matmul %108, %109, %cst_50 {dimension_numbers = #tpu.dot_dimension_numbers<[1], [0], [0], [1], [0, 0, 1, 1], [], []>} : vector<8x32xbf16>, vector<32x128xbf16>, vector<8x128xf32> -> vector<8x128xf32>
    %c0_51 = arith.constant 0 : index
    %c0_52 = arith.constant 0 : index
    %111 = vector.load %arg17[%c0_51, %c0_52] : memref<1x128xf32, #tpu.memory_space<vmem>>, vector<1x128xf32>
    %112 = vector.broadcast %111 : vector<1x128xf32> to vector<8x128xf32>
    %113 = arith.addf %110, %112 : vector<8x128xf32>
    %cst_53 = arith.constant 5.000000e-01 : f32
    %114 = vector.broadcast %cst_53 : f32 to vector<8x128xf32>
    %115 = arith.mulf %114, %113 : vector<8x128xf32>
    %cst_54 = arith.constant 0.707106769 : f32
    %116 = vector.broadcast %cst_54 : f32 to vector<8x128xf32>
    %117 = arith.mulf %113, %116 : vector<8x128xf32>
    %118 = math.absf %117 : vector<8x128xf32>
    %cst_55 = arith.constant 0.327591091 : f32
    %119 = vector.broadcast %cst_55 : f32 to vector<8x128xf32>
    %120 = arith.mulf %119, %118 : vector<8x128xf32>
    %cst_56 = arith.constant 1.000000e+00 : f32
    %121 = vector.broadcast %cst_56 : f32 to vector<8x128xf32>
    %122 = arith.addf %121, %120 : vector<8x128xf32>
    %cst_57 = arith.constant 1.000000e+00 : f32
    %123 = vector.broadcast %cst_57 : f32 to vector<8x128xf32>
    %124 = arith.divf %123, %122 : vector<8x128xf32>
    %cst_58 = arith.constant 1.06140542 : f32
    %125 = vector.broadcast %cst_58 : f32 to vector<8x128xf32>
    %126 = arith.mulf %125, %124 : vector<8x128xf32>
    %cst_59 = arith.constant -1.45315206 : f32
    %127 = vector.broadcast %cst_59 : f32 to vector<8x128xf32>
    %128 = arith.addf %126, %127 : vector<8x128xf32>
    %129 = arith.mulf %128, %124 : vector<8x128xf32>
    %cst_60 = arith.constant 1.42141378 : f32
    %130 = vector.broadcast %cst_60 : f32 to vector<8x128xf32>
    %131 = arith.addf %129, %130 : vector<8x128xf32>
    %132 = arith.mulf %131, %124 : vector<8x128xf32>
    %cst_61 = arith.constant -0.284496725 : f32
    %133 = vector.broadcast %cst_61 : f32 to vector<8x128xf32>
    %134 = arith.addf %132, %133 : vector<8x128xf32>
    %135 = arith.mulf %134, %124 : vector<8x128xf32>
    %cst_62 = arith.constant 0.254829586 : f32
    %136 = vector.broadcast %cst_62 : f32 to vector<8x128xf32>
    %137 = arith.addf %135, %136 : vector<8x128xf32>
    %138 = arith.mulf %137, %124 : vector<8x128xf32>
    %cst_63 = arith.constant 0.000000e+00 : f32
    %139 = vector.broadcast %cst_63 : f32 to vector<8x128xf32>
    %140 = arith.subf %139, %118 : vector<8x128xf32>
    %141 = arith.mulf %140, %118 : vector<8x128xf32>
    %142 = math.exp %141 : vector<8x128xf32>
    %143 = arith.mulf %138, %142 : vector<8x128xf32>
    %cst_64 = arith.constant 1.000000e+00 : f32
    %144 = vector.broadcast %cst_64 : f32 to vector<8x128xf32>
    %145 = arith.subf %144, %143 : vector<8x128xf32>
    %cst_65 = arith.constant 0.000000e+00 : f32
    %146 = vector.broadcast %cst_65 : f32 to vector<8x128xf32>
    %147 = arith.cmpf oge, %117, %146 : vector<8x128xf32>
    %cst_66 = arith.constant 0.000000e+00 : f32
    %148 = vector.broadcast %cst_66 : f32 to vector<8x128xf32>
    %149 = arith.subf %148, %145 : vector<8x128xf32>
    %150 = arith.select %147, %145, %149 : vector<8x128xi1>, vector<8x128xf32>
    %cst_67 = arith.constant 1.000000e+00 : f32
    %151 = vector.broadcast %cst_67 : f32 to vector<8x128xf32>
    %152 = arith.addf %151, %150 : vector<8x128xf32>
    %153 = arith.mulf %115, %152 : vector<8x128xf32>
    %154 = arith.truncf %153 : vector<8x128xf32> to vector<8x128xbf16>
    %c0_68 = arith.constant 0 : index
    %c0_69 = arith.constant 0 : index
    %155 = vector.load %arg18[%c0_68, %c0_69] : memref<128x32xbf16, #tpu.memory_space<vmem>>, vector<128x32xbf16>
    %cst_70 = arith.constant dense<0.000000e+00> : vector<8x32xf32>
    %156 = tpu.matmul %154, %155, %cst_70 {dimension_numbers = #tpu.dot_dimension_numbers<[1], [0], [0], [1], [0, 0, 1, 1], [], []>} : vector<8x128xbf16>, vector<128x32xbf16>, vector<8x32xf32> -> vector<8x32xf32>
    %c0_71 = arith.constant 0 : index
    %c0_72 = arith.constant 0 : index
    %157 = vector.load %arg19[%c0_71, %c0_72] : memref<1x32xf32, #tpu.memory_space<vmem>>, vector<1x32xf32>
    %158 = vector.broadcast %157 : vector<1x32xf32> to vector<8x32xf32>
    %159 = arith.addf %156, %158 : vector<8x32xf32>
    %160 = arith.addf %83, %159 : vector<8x32xf32>
    %c0_73 = arith.constant 0 : index
    %c0_74 = arith.constant 0 : index
    %161 = vector.load %arg20[%c0_73, %c0_74] : memref<1x32xf32, #tpu.memory_space<vmem>>, vector<1x32xf32>
    %c0_75 = arith.constant 0 : index
    %c0_76 = arith.constant 0 : index
    %162 = vector.load %arg21[%c0_75, %c0_76] : memref<1x32xf32, #tpu.memory_space<vmem>>, vector<1x32xf32>
    %cst_77 = arith.constant dense<0.000000e+00> : vector<8xf32>
    %163 = vector.multi_reduction <add>, %160, %cst_77 [1] : vector<8x32xf32> to vector<8xf32>
    %164 = vector.shape_cast %163 : vector<8xf32> to vector<8x1xf32>
    %cst_78 = arith.constant 3.200000e+01 : f32
    %165 = vector.broadcast %cst_78 : f32 to vector<8x1xf32>
    %166 = arith.divf %164, %165 : vector<8x1xf32>
    %167 = vector.broadcast %166 : vector<8x1xf32> to vector<8x32xf32>
    %168 = arith.subf %160, %167 : vector<8x32xf32>
    %169 = arith.mulf %168, %168 : vector<8x32xf32>
    %cst_79 = arith.constant dense<0.000000e+00> : vector<8xf32>
    %170 = vector.multi_reduction <add>, %169, %cst_79 [1] : vector<8x32xf32> to vector<8xf32>
    %171 = vector.shape_cast %170 : vector<8xf32> to vector<8x1xf32>
    %cst_80 = arith.constant 3.200000e+01 : f32
    %172 = vector.broadcast %cst_80 : f32 to vector<8x1xf32>
    %173 = arith.divf %171, %172 : vector<8x1xf32>
    %174 = vector.broadcast %166 : vector<8x1xf32> to vector<8x32xf32>
    %175 = arith.subf %160, %174 : vector<8x32xf32>
    %cst_81 = arith.constant 9.99999997E-7 : f32
    %176 = vector.broadcast %cst_81 : f32 to vector<8x1xf32>
    %177 = arith.addf %173, %176 : vector<8x1xf32>
    %178 = math.rsqrt %177 : vector<8x1xf32>
    %179 = vector.broadcast %178 : vector<8x1xf32> to vector<8x32xf32>
    %180 = arith.mulf %175, %179 : vector<8x32xf32>
    %181 = vector.broadcast %161 : vector<1x32xf32> to vector<8x32xf32>
    %182 = arith.mulf %180, %181 : vector<8x32xf32>
    %183 = vector.broadcast %162 : vector<1x32xf32> to vector<8x32xf32>
    %184 = arith.addf %182, %183 : vector<8x32xf32>
    %cst_82 = arith.constant 0.000000e+00 : f32
    %185 = vector.broadcast %cst_82 : f32 to vector<8x96xf32>
    %186 = tpu.concatenate %184, %185 in 1 : vector<8x32xf32>, vector<8x96xf32> -> vector<8x128xf32>
    %c0_83 = arith.constant 0 : index
    %c0_84 = arith.constant 0 : index
    %187 = vector.load %arg24[%c0_83, %c0_84] : memref<8x128xf32, #tpu.memory_space<vmem>>, vector<8x128xf32>
    tpu.vector_store %arg24[%c0_83, %c0_84], %186 {strides = array<i32>} : memref<8x128xf32, #tpu.memory_space<vmem>>, vector<8x128xf32>,
    %188 = arith.mulf %184, %184 : vector<8x32xf32>
    %cst_85 = arith.constant dense<0.000000e+00> : vector<8xf32>
    %189 = vector.multi_reduction <add>, %188, %cst_85 [1] : vector<8x32xf32> to vector<8xf32>
    %190 = vector.shape_cast %189 : vector<8xf32> to vector<8x1xf32>
    %191 = math.sqrt %190 : vector<8x1xf32>
    %cst_86 = arith.constant 1.000000e+00 : f32
    %192 = vector.broadcast %cst_86 : f32 to vector<8x1xf32>
    %193 = arith.addf %192, %191 : vector<8x1xf32>
    %194 = vector.broadcast %193 : vector<8x1xf32> to vector<8x32xf32>
    %195 = arith.divf %184, %194 : vector<8x32xf32>
    %c0_87 = arith.constant 0 : index
    %c0_88 = arith.constant 0 : index
    %196 = vector.load %arg22[%c0_87, %c0_88] : memref<32x128xf32, #tpu.memory_space<vmem>>, vector<32x128xf32>
    %cst_89 = arith.constant dense<0.000000e+00> : vector<8x128xf32>
    %197 = tpu.matmul %195, %196, %cst_89 {dimension_numbers = #tpu.dot_dimension_numbers<[1], [0], [0], [1], [0, 0, 1, 1], [], []>} : vector<8x32xf32>, vector<32x128xf32>, vector<8x128xf32> -> vector<8x128xf32>
    %cst_90 = arith.constant 3.000000e+01 : f32
    %198 = vector.broadcast %cst_90 : f32 to vector<8x128xf32>
    %199 = arith.mulf %198, %197 : vector<8x128xf32>
    %c0_91 = arith.constant 0 : index
    %c0_92 = arith.constant 0 : index
    %200 = vector.load %arg23[%c0_91, %c0_92] : memref<8x128xf32, #tpu.memory_space<vmem>>, vector<8x128xf32>
    tpu.vector_store %arg23[%c0_91, %c0_92], %199 {strides = array<i32>} : memref<8x128xf32, #tpu.memory_space<vmem>>, vector<8x128xf32>,
    return
  }
  func.func @transform_0(%arg0: i32) -> (i32, i32, i32) {
    %c0_i32 = arith.constant 0 : i32
    %c0_i32_0 = arith.constant 0 : i32
    %c0_i32_1 = arith.constant 0 : i32
    return %arg0, %c0_i32, %c0_i32_0 : i32, i32, i32
  }
  func.func @transform_1(%arg0: i32) -> (i32, i32) {
    %c0_i32 = arith.constant 0 : i32
    %c0_i32_0 = arith.constant 0 : i32
    %c0_i32_1 = arith.constant 0 : i32
    return %c0_i32, %c0_i32_0 : i32, i32
  }
  func.func @transform_2(%arg0: i32) -> (i32, i32) {
    %c0_i32 = arith.constant 0 : i32
    %c0_i32_0 = arith.constant 0 : i32
    %c0_i32_1 = arith.constant 0 : i32
    return %c0_i32, %c0_i32_0 : i32, i32
  }
  func.func @transform_3(%arg0: i32) -> (i32, i32) {
    %c0_i32 = arith.constant 0 : i32
    %c0_i32_0 = arith.constant 0 : i32
    %c0_i32_1 = arith.constant 0 : i32
    return %c0_i32, %c0_i32_0 : i32, i32
  }
  func.func @transform_4(%arg0: i32) -> (i32, i32) {
    %c0_i32 = arith.constant 0 : i32
    %c0_i32_0 = arith.constant 0 : i32
    %c0_i32_1 = arith.constant 0 : i32
    return %c0_i32, %c0_i32_0 : i32, i32
  }
  func.func @transform_5(%arg0: i32) -> (i32, i32) {
    %c0_i32 = arith.constant 0 : i32
    %c0_i32_0 = arith.constant 0 : i32
    %c0_i32_1 = arith.constant 0 : i32
    return %c0_i32, %c0_i32_0 : i32, i32
  }
  func.func @transform_6(%arg0: i32) -> (i32, i32) {
    %c0_i32 = arith.constant 0 : i32
    %c0_i32_0 = arith.constant 0 : i32
    %c0_i32_1 = arith.constant 0 : i32
    return %c0_i32, %c0_i32_0 : i32, i32
  }
  func.func @transform_7(%arg0: i32) -> (i32, i32) {
    %c0_i32 = arith.constant 0 : i32
    %c0_i32_0 = arith.constant 0 : i32
    %c0_i32_1 = arith.constant 0 : i32
    return %c0_i32, %c0_i32_0 : i32, i32
  }
  func.func @transform_8(%arg0: i32) -> (i32, i32) {
    %c0_i32 = arith.constant 0 : i32
    %c0_i32_0 = arith.constant 0 : i32
    %c0_i32_1 = arith.constant 0 : i32
    return %c0_i32, %c0_i32_0 : i32, i32
  }
  func.func @transform_9(%arg0: i32) -> (i32, i32) {
    %c0_i32 = arith.constant 0 : i32
    %c0_i32_0 = arith.constant 0 : i32
    %c0_i32_1 = arith.constant 0 : i32
    return %c0_i32, %c0_i32_0 : i32, i32
  }
  func.func @transform_10(%arg0: i32) -> (i32, i32) {
    %c0_i32 = arith.constant 0 : i32
    %c0_i32_0 = arith.constant 0 : i32
    %c0_i32_1 = arith.constant 0 : i32
    return %c0_i32, %c0_i32_0 : i32, i32
  }
  func.func @transform_11(%arg0: i32) -> (i32, i32) {
    %c0_i32 = arith.constant 0 : i32
    %c0_i32_0 = arith.constant 0 : i32
    %c0_i32_1 = arith.constant 0 : i32
    return %c0_i32, %c0_i32_0 : i32, i32
  }
  func.func @transform_12(%arg0: i32) -> (i32, i32) {
    %c0_i32 = arith.constant 0 : i32
    %c0_i32_0 = arith.constant 0 : i32
    %c0_i32_1 = arith.constant 0 : i32
    return %c0_i32, %c0_i32_0 : i32, i32
  }
  func.func @transform_13(%arg0: i32) -> (i32, i32) {
    %c0_i32 = arith.constant 0 : i32
    %c0_i32_0 = arith.constant 0 : i32
    %c0_i32_1 = arith.constant 0 : i32
    return %c0_i32, %c0_i32_0 : i32, i32
  }
  func.func @transform_14(%arg0: i32) -> (i32, i32) {
    %c0_i32 = arith.constant 0 : i32
    %c0_i32_0 = arith.constant 0 : i32
    %c0_i32_1 = arith.constant 0 : i32
    return %c0_i32, %c0_i32_0 : i32, i32
  }
  func.func @transform_15(%arg0: i32) -> (i32, i32) {
    %c0_i32 = arith.constant 0 : i32
    %c0_i32_0 = arith.constant 0 : i32
    %c0_i32_1 = arith.constant 0 : i32
    return %c0_i32, %c0_i32_0 : i32, i32
  }
  func.func @transform_16(%arg0: i32) -> (i32, i32) {
    %c0_i32 = arith.constant 0 : i32
    %c0_i32_0 = arith.constant 0 : i32
    %c0_i32_1 = arith.constant 0 : i32
    return %c0_i32, %c0_i32_0 : i32, i32
  }
  func.func @transform_17(%arg0: i32) -> (i32, i32) {
    %c0_i32 = arith.constant 0 : i32
    %c0_i32_0 = arith.constant 0 : i32
    %c0_i32_1 = arith.constant 0 : i32
    return %c0_i32, %c0_i32_0 : i32, i32
  }
  func.func @transform_18(%arg0: i32) -> (i32, i32) {
    %c0_i32 = arith.constant 0 : i32
    %c0_i32_0 = arith.constant 0 : i32
    %c0_i32_1 = arith.constant 0 : i32
    return %c0_i32, %c0_i32_0 : i32, i32
  }
  func.func @transform_19(%arg0: i32) -> (i32, i32) {
    %c0_i32 = arith.constant 0 : i32
    %c0_i32_0 = arith.constant 0 : i32
    %c0_i32_1 = arith.constant 0 : i32
    return %c0_i32, %c0_i32_0 : i32, i32
  }
  func.func @transform_20(%arg0: i32) -> (i32, i32) {
    %c0_i32 = arith.constant 0 : i32
    %c0_i32_0 = arith.constant 0 : i32
    %c0_i32_1 = arith.constant 0 : i32
    return %c0_i32, %c0_i32_0 : i32, i32
  }
  func.func @transform_21(%arg0: i32) -> (i32, i32) {
    %c0_i32 = arith.constant 0 : i32
    %c0_i32_0 = arith.constant 0 : i32
    %c0_i32_1 = arith.constant 0 : i32
    return %c0_i32, %c0_i32_0 : i32, i32
  }
  func.func @transform_22(%arg0: i32) -> (i32, i32) {
    %c0_i32 = arith.constant 0 : i32
    %c0_i32_0 = arith.constant 0 : i32
    return %arg0, %c0_i32 : i32, i32
  }
  func.func @transform_23(%arg0: i32) -> (i32, i32) {
    %c0_i32 = arith.constant 0 : i32
    %c0_i32_0 = arith.constant 0 : i32
    return %arg0, %c0_i32 : i32, i32
  }
}

</mosaic_0001>

<bundles_post_ra>
// kernel: tpu_custom_call.1
= control target key start
LH: loop header
LB: loop body
LE: loop exit
PB: predicated region body
PF: predicated region fallthrough
CT: control target
= control target key end

     0   :  { %6 = vsyncpa [#allocation3], 0  ;;  %s341_s0 = inlined_call_operand.hbm [shape: f32[8,128], index: 0, kind: input, shape index: {}]   ;;  %s342_s1 = inlined_call_operand.hbm [shape: f32[8,128], index: 1, kind: output, shape index: {}]  }
   0x1   :  { %7 = vsyncpa [#allocation4], 0  ;;  %s262_s6 = smov 0  }
   0x2 LB: > { %s145_s7 = sadd.s32 4294967295, %s248_s6   ;;  %p146_p0 = scmp.ge.s32.totalorder %s248_s6, 1  ;;  %s248_s6 = sphi %s262_s6, %s13_s6  }
   0x3   : > { %p60_p1 = scmp.lt.s32.totalorder %s248_s6, 3  ;;  %p276_p3 = scmp.eq.s32.totalorder %s145_s7, 0 }
   0x4   : > { %s250_s10 = smov [#allocation2]   ;;  %s180_s15 = scalar_lea.hbm %s341_s0, 128 }
   0x5   : > { %p270_p2 = pnand %p146_p0, %p60_p1  ;;  %s73_s11 = sshll.u32 %s250_s10, 4  ;;  %s74_s11 = int_to_ptr.vmem [resolvable:$true] %s73_s11 }
   0x6   : > { %s347_s9 = scalar_select %p276_p3, 1, 0 }
   0x7   : > { %s346_s8 = scalar_select %p270_p2, 1, 0 }
   0x8   : > { %p162_p4 = pneg %p270_p2  ;;  %p181_p6 = scmp.ne.s32.totalorder %s341_s0, %s180_s15 }
   0x9   : > { %p187_p10 = scmp.lt.u32.totalorder %s180_s15, %s341_s0 }
   0xa   : > { %p284_p5 = pnand %p276_p3, %p162_p4 }
   0xc   : > { %p182_p7 = pneg %p284_p5 }
   0xe   : > { %p183_p8 = pnand %p182_p7, %p181_p6 }
  0x10   : > { %p184_p9 = pneg %p183_p8 }
  0x12   : > { %p189_p11 = pnand %p187_p10, %p184_p9 }
  0x14   : > { %192 = shalt.err (!%p189_p11)
}
  0x15   : > { %s193_s20 = scalar_lea.vmem %s74_s11, 128  ;;  %p201_p1 = scmp.lt.s32.totalorder %s74_s11, %s74_s11 }
  0x16   : > { %p194_p12 = scmp.ne.s32.totalorder %s74_s11, %s193_s20  ;;  %p202_p4 = scmp.lt.s32.totalorder %s193_s20, %s193_s20 }
  0x18   : > { %p196_p13 = pnand %p194_p12, %p182_p7  ;;  %p203_p3 = por %p202_p4, %p201_p1 }
  0x1a   : > { %p197_p0 = pneg %p196_p13 }
  0x1c   : > { %p204_p2 = pnand %p203_p3, %p197_p0 }
  0x1e   : > { %207 = shalt.err (!%p204_p2)
}
  0x1f   : > { %165 = dma.hbm_to_vmem [thread:$0]  (!%p284_p5), %s341_s0, 128, %s74_s11, [#allocation3]  }
  0x20   : > { %p349_p6 = scmp.ne.s32.totalorder %s346_s8, 0 }
  0x21   : > { %p350_p8 = scmp.ne.s32.totalorder (!%p349_p6), %s347_s9, 0 }
  0x22   : > { %86 = sbr.rel (%p349_p6) target bundleno = 67 (0x43), region = 24 }
  0x29   : > { %239 = dma.done.wait (%p350_p8), [#allocation3], 128  }
  0x2a   : > { %241 = vsyncadd (%p350_p8), [#allocation3], 4294967168  ;;  %s251_s23 = smov [#allocation5]   ;;  %v96_v0 = vld [vmem:[#allocation2] sm:$0xff]  ;;  %p312_p2 = scmp.eq.s32.totalorder %s145_s7, 1 }
  0x2b   : > { %s106_s24 = sshll.u32 %s251_s23, 4  ;;  %v97_v1 = vadd.f32 1.0, %v96_v0  ;;  %s107_s24 = int_to_ptr.vmem [resolvable:$true] %s106_s24 }
  0x2c   : > { %s208_s26 = scalar_lea.vmem %s107_s24, 128  ;;  %p215_p9 = scmp.lt.s32.totalorder %s107_s24, %s107_s24 }
  0x2d   : > { %98 = vst [vmem:[#allocation5] sm:$0xff] %v97_v1  ;;  %p209_p3 = scmp.ne.s32.totalorder %s107_s24, %s208_s26  ;;  %p216_p10 = scmp.lt.s32.totalorder %s208_s26, %s208_s26 }
  0x2f   : > { %p210_p5 = pnand %p209_p3, %p312_p2  ;;  %p217_p11 = por %p216_p10, %p215_p9 }
  0x31   : > { %p211_p7 = pneg %p210_p5 }
  0x33   : > { %p218_p12 = pnand %p217_p11, %p211_p7 }
  0x35   : > { %221 = shalt.err (!%p218_p12)
}
  0x36   : > { %s222_s29 = scalar_lea.hbm %s342_s1, 128 }
  0x37   : > { %p223_p13 = scmp.ne.s32.totalorder %s342_s1, %s222_s29  ;;  %p228_p4 = scmp.lt.u32.totalorder %s222_s29, %s342_s1 }
  0x39   : > { %p224_p0 = pnand %p223_p13, %p312_p2 }
  0x3b   : > { %p225_p1 = pneg %p224_p0 }
  0x3d   : > { %p230_p6 = pnand %p228_p4, %p225_p1 }
  0x3f   : > { %233 = shalt.err (!%p230_p6)
}
  0x40   : > { %159 = dma.vmem_to_hbm [thread:$0]  (%p312_p2), %s107_s24, 128, %s342_s1, [#allocation4]  }
  0x41   : > { %243 = dma.done.wait (%p312_p2), [#allocation4], 128  }
  0x42   : > { %245 = vsyncadd (%p312_p2), [#allocation4], 4294967168 }
  0x43 PF: > { %s13_s6 = sadd.s32 1, %s248_s6  }
  0x44   : > { %p10_p8 = scmp.ge.s32.totalorder %s13_s6, 4  }
  0x46   :  { %12 = sbr.rel (!%p10_p8) target bundleno = 2 (0x2), region = 53 }
  0x4d   :  { %119 = vsyncpa [#allocation3], 1 }
  0x4e   :  { %121 = vsyncpa [#allocation3 + $0x1], 1 }
  0x4f   :  { %122 = vsyncpa [#allocation4], 1 }
  0x50   :  { %124 = vsyncpa [#allocation4 + $0x1], 1 }

// kernel: tpu_custom_call.1
= control target key start
LH: loop header
LB: loop body
LE: loop exit
PB: predicated region body
PF: predicated region fallthrough
CT: control target
= control target key end

     0   :  { %s3472_s0 = inlined_call_operand.vmem [shape: f32[8,8,32], index: 0, kind: input, shape index: {}]   ;;  %s3473_s1 = inlined_call_operand.vmem [shape: f32[1,32], index: 1, kind: input, shape index: {}]   ;;  %s3474_s2 = inlined_call_operand.hbm [shape: f32[1,32], index: 2, kind: input, shape index: {}]   ;;  %s3475_s3 = inlined_call_operand.hbm [shape: bf16[32,32], index: 3, kind: input, shape index: {}]   ;;  %s3476_s4 = inlined_call_operand.hbm [shape: f32[1,32], index: 4, kind: input, shape index: {}]   ;;  %s3477_s5 = inlined_call_operand.hbm [shape: bf16[32,32], index: 5, kind: input, shape index: {}]   ;;  %s3478_s6 = inlined_call_operand.hbm [shape: f32[1,32], index: 6, kind: input, shape index: {}]   ;;  %s3479_s7 = inlined_call_operand.hbm [shape: bf16[32,32], index: 7, kind: input, shape index: {}]   ;;  %s3480_s8 = inlined_call_operand.hbm [shape: f32[1,32], index: 8, kind: input, shape index: {}]   ;;  %s3481_s9 = inlined_call_operand.vmem [shape: bf16[32,8], index: 9, kind: input, shape index: {}]   ;;  %s3482_s10 = inlined_call_operand.hbm [shape: bf16[8,32], index: 10, kind: input, shape index: {}]   ;;  %s3483_s11 = inlined_call_operand.vmem [shape: bf16[32,32], index: 11, kind: input, shape index: {}]   ;;  %s3484_s12 = inlined_call_operand.hbm [shape: f32[1,32], index: 12, kind: input, shape index: {}]   ;;  %s3485_s13 = inlined_call_operand.vmem [shape: f32[1,32], index: 13, kind: input, shape index: {}]   ;;  %s3486_s14 = inlined_call_operand.vmem [shape: f32[1,32], index: 14, kind: input, shape index: {}]   ;;  %s3487_s15 = inlined_call_operand.vmem [shape: bf16[32,128], index: 15, kind: input, shape index: {}]   ;;  %s3488_s16 = inlined_call_operand.vmem [shape: f32[1,128], index: 16, kind: input, shape index: {}]   ;;  %s3489_s17 = inlined_call_operand.vmem [shape: bf16[128,32], index: 17, kind: input, shape index: {}]   ;;  %s3490_s18 = inlined_call_operand.vmem [shape: f32[1,32], index: 18, kind: input, shape index: {}]   ;;  %s3491_s19 = inlined_call_operand.vmem [shape: f32[1,32], index: 19, kind: input, shape index: {}]   ;;  %s3492_s20 = inlined_call_operand.vmem [shape: f32[1,32], index: 20, kind: input, shape index: {}]   ;;  %s3493_s21 = inlined_call_operand.vmem [shape: f32[32,128], index: 21, kind: input, shape index: {}]   ;;  %s3494_s22 = inlined_call_operand.hbm [shape: f32[8,128], index: 22, kind: output, shape index: {0}]   ;;  %s3495_s23 = inlined_call_operand.hbm [shape: f32[8,128], index: 23, kind: output, shape index: {1}]  }
   0x1   :  { %3506 = sst [smem:[#allocation27_spill]] %s3472_s0 }
   0x2   :  { %3507 = sst [smem:[#allocation28_spill]] %s3473_s1 }
   0x3   :  { %3508 = sst [smem:[#allocation29_spill]] %s3474_s2 }
   0x4   :  { %3509 = sst [smem:[#allocation30_spill]] %s3475_s3 }
   0x5   :  { %3510 = sst [smem:[#allocation31_spill]] %s3476_s4 }
   0x6   :  { %3511 = sst [smem:[#allocation32_spill]] %s3477_s5 }
   0x7   :  { %3512 = sst [smem:[#allocation33_spill]] %s3478_s6 }
   0x8   :  { %3513 = sst [smem:[#allocation34_spill]] %s3479_s7 }
   0x9   :  { %3514 = sst [smem:[#allocation35_spill]] %s3493_s21 }
   0xa   :  { %3515 = sst [smem:[#allocation36_spill]] %s3494_s22 }
   0xb   :  { %3516 = sst [smem:[#allocation37_spill]] %s3495_s23 }
   0xc   :  { %29 = vsyncpa [#allocation3], 0 }
   0xd   :  { %30 = vsyncpa [#allocation6], 0 }
   0xe   :  { %31 = vsyncpa [#allocation9], 0 }
   0xf   :  { %32 = vsyncpa [#allocation12], 0 }
  0x10   :  { %33 = vsyncpa [#allocation15], 0 }
  0x11   :  { %34 = vsyncpa [#allocation4], 0 }
  0x12   :  { %35 = vsyncpa [#allocation19], 0  ;;  %s2715_s4 = smov [#allocation5]   ;;  %s3517_s5 = sld [smem:[#allocation30_spill]] }
  0x13   :  { %s55_s30 = sshll.u32 %s2715_s4, 4  ;;  %s56_s30 = int_to_ptr.vmem [resolvable:$true] %s55_s30 }
  0x18   :  { %s2459_s1 = scalar_lea.hbm %s3517_s5, 256 }
  0x19   :  { %p2460_p0 = scmp.ne.s32.totalorder %s3517_s5, %s2459_s1  ;;  %p2463_p1 = scmp.lt.u32.totalorder %s2459_s1, %s3517_s5 }
  0x1b   :  { %p2465_p2 = pnand %p2463_p1, %p2460_p0 }
  0x1d   :  { %2468 = shalt.err (!%p2465_p2)
}
  0x1e   :  { %s2469_s7 = scalar_lea.vmem %s56_s30, 256  ;;  %p2474_p4 = scmp.lt.s32.totalorder %s56_s30, %s56_s30 }
  0x1f   :  { %p2470_p3 = scmp.ne.s32.totalorder %s56_s30, %s2469_s7  ;;  %p2475_p5 = scmp.lt.s32.totalorder %s2469_s7, %s2469_s7 }
  0x21   :  { %p2476_p6 = por %p2475_p5, %p2474_p4 }
  0x23   :  { %p2477_p7 = pnand %p2476_p6, %p2470_p3 }
  0x25   :  { %2480 = shalt.err (!%p2477_p7)
}
  0x26   :  { %s2716_s28 = smov 64   ;;  %s2717_s29 = smov 4  }
  0x27   :  { %61 = dma.hbm_to_vmem [thread:$0]  %s3517_s5, 256, %s56_s30, [#allocation6], %s2716_s28, %s2716_s28, %s2717_s29  }
  0x28   :  { %s2718_s4 = smov [#allocation8]   ;;  %s2719_s25 = smov [#allocation11]  }
  0x29   :  { %s77_s24 = sshll.u32 %s2718_s4, 4  ;;  %s99_s1 = sshll.u32 %s2719_s25, 4  ;;  %s78_s24 = int_to_ptr.vmem [resolvable:$true] %s77_s24  ;;  %s100_s1 = int_to_ptr.vmem [resolvable:$true] %s99_s1 }
  0x2a   :  { %s3518_s6 = sld [smem:[#allocation32_spill]] }
  0x30   :  { %s2481_s27 = scalar_lea.hbm %s3518_s6, 256 }
  0x31   :  { %p2482_p8 = scmp.ne.s32.totalorder %s3518_s6, %s2481_s27  ;;  %p2485_p9 = scmp.lt.u32.totalorder %s2481_s27, %s3518_s6 }
  0x33   :  { %p2487_p10 = pnand %p2485_p9, %p2482_p8 }
  0x35   :  { %2490 = shalt.err (!%p2487_p10)
}
  0x36   :  { %s2491_s30 = scalar_lea.vmem %s78_s24, 256  ;;  %p2496_p12 = scmp.lt.s32.totalorder %s78_s24, %s78_s24 }
  0x37   :  { %p2492_p11 = scmp.ne.s32.totalorder %s78_s24, %s2491_s30  ;;  %p2497_p13 = scmp.lt.s32.totalorder %s2491_s30, %s2491_s30 }
  0x39   :  { %p2498_p0 = por %p2497_p13, %p2496_p12 }
  0x3b   :  { %p2499_p1 = pnand %p2498_p0, %p2492_p11 }
  0x3d   :  { %2502 = shalt.err (!%p2499_p1)
}
  0x3e   :  { %83 = dma.hbm_to_vmem [thread:$0]  %s3518_s6, 256, %s78_s24, [#allocation9], %s2716_s28, %s2716_s28, %s2717_s29  }
  0x3f   :  { %s3519_s23 = sld [smem:[#allocation34_spill]] }
  0x45   :  { %s2503_s0 = scalar_lea.hbm %s3519_s23, 256 }
  0x46   :  { %p2504_p2 = scmp.ne.s32.totalorder %s3519_s23, %s2503_s0  ;;  %p2507_p3 = scmp.lt.u32.totalorder %s2503_s0, %s3519_s23 }
  0x48   :  { %p2509_p4 = pnand %p2507_p3, %p2504_p2 }
  0x4a   :  { %2512 = shalt.err (!%p2509_p4)
}
  0x4b   :  { %s2513_s27 = scalar_lea.vmem %s100_s1, 256  ;;  %p2518_p6 = scmp.lt.s32.totalorder %s100_s1, %s100_s1 }
  0x4c   :  { %p2514_p5 = scmp.ne.s32.totalorder %s100_s1, %s2513_s27  ;;  %p2519_p7 = scmp.lt.s32.totalorder %s2513_s27, %s2513_s27 }
  0x4e   :  { %p2520_p8 = por %p2519_p7, %p2518_p6 }
  0x50   :  { %p2521_p9 = pnand %p2520_p8, %p2514_p5 }
  0x52   :  { %2524 = shalt.err (!%p2521_p9)
}
  0x53   :  { %105 = dma.hbm_to_vmem [thread:$0]  %s3519_s23, 256, %s100_s1, [#allocation12], %s2716_s28, %s2716_s28, %s2717_s29  }
  0x54   :  { %s2720_s7 = smov [#allocation14]   ;;  %s2721_s5 = smov [#allocation2]  }
  0x55   :  { %s124_s30 = sshll.u32 %s2720_s7, 4  ;;  %s46_s3 = sshll.u32 %s2721_s5, 4  ;;  %s125_s30 = int_to_ptr.vmem [resolvable:$true] %s124_s30  ;;  %s47_s3 = int_to_ptr.vmem [resolvable:$true] %s46_s3 }
  0x56   :  { %s2525_s0 = scalar_lea.hbm %s3482_s10, 64 }
  0x57   :  { %p2526_p10 = scmp.ne.s32.totalorder %s3482_s10, %s2525_s0  ;;  %p2529_p11 = scmp.lt.u32.totalorder %s2525_s0, %s3482_s10 }
  0x59   :  { %p2531_p12 = pnand %p2529_p11, %p2526_p10 }
  0x5b   :  { %2534 = shalt.err (!%p2531_p12)
}
  0x5c   :  { %s2535_s28 = scalar_lea.vmem %s125_s30, 64  ;;  %p2540_p0 = scmp.lt.s32.totalorder %s125_s30, %s125_s30 }
  0x5d   :  { %p2536_p13 = scmp.ne.s32.totalorder %s125_s30, %s2535_s28  ;;  %p2541_p1 = scmp.lt.s32.totalorder %s2535_s28, %s2535_s28 }
  0x5f   :  { %p2542_p2 = por %p2541_p1, %p2540_p0 }
  0x61   :  { %p2543_p3 = pnand %p2542_p2, %p2536_p13 }
  0x63   :  { %2546 = shalt.err (!%p2543_p3)
}
  0x64   :  { %127 = dma.hbm_to_vmem [thread:$0]  %s3482_s10, 64, %s125_s30, [#allocation15]  }
  0x65   :  { %s3520_s24 = sld [smem:[#allocation29_spill]] }
  0x6b   :  { %s2547_s6 = scalar_lea.hbm %s3520_s24, 16 }
  0x6c   :  { %p2548_p4 = scmp.ne.s32.totalorder %s3520_s24, %s2547_s6  ;;  %p2551_p5 = scmp.lt.u32.totalorder %s2547_s6, %s3520_s24 }
  0x6e   :  { %p2553_p6 = pnand %p2551_p5, %p2548_p4 }
  0x70   :  { %2556 = shalt.err (!%p2553_p6)
}
  0x71   :  { %s2557_s0 = scalar_lea.vmem %s47_s3, 16  ;;  %s2561_s4 = scalar_lea.vmem %s47_s3, 32 }
  0x72   :  { %p2558_p7 = scmp.ne.s32.totalorder %s47_s3, %s2557_s0  ;;  %p2562_p8 = scmp.lt.s32.totalorder %s47_s3, %s47_s3 }
  0x73   :  { %p2563_p9 = scmp.lt.s32.totalorder %s2561_s4, %s2557_s0 }
  0x75   :  { %p2564_p10 = por %p2563_p9, %p2562_p8 }
  0x77   :  { %p2565_p11 = pnand %p2564_p10, %p2558_p7 }
  0x79   :  { %2568 = shalt.err (!%p2565_p11)
}
  0x7a   :  { %49 = dma.hbm_to_vmem [thread:$0]  %s3520_s24, 16, %s47_s3, [#allocation3]  }
  0x7b   :  { %s2722_s25 = smov [#allocation7]   ;;  %s2723_s2 = smov [#allocation10]  }
  0x7c   :  { %s68_s26 = sshll.u32 %s2722_s25, 4  ;;  %s90_s28 = sshll.u32 %s2723_s2, 4  ;;  %s69_s26 = int_to_ptr.vmem [resolvable:$true] %s68_s26  ;;  %s91_s28 = int_to_ptr.vmem [resolvable:$true] %s90_s28 }
  0x7d   :  { %s3521_s23 = sld [smem:[#allocation31_spill]] }
  0x83   :  { %s2569_s27 = scalar_lea.hbm %s3521_s23, 16 }
  0x84   :  { %p2570_p12 = scmp.ne.s32.totalorder %s3521_s23, %s2569_s27  ;;  %p2573_p13 = scmp.lt.u32.totalorder %s2569_s27, %s3521_s23 }
  0x86   :  { %p2575_p0 = pnand %p2573_p13, %p2570_p12 }
  0x88   :  { %2578 = shalt.err (!%p2575_p0)
}
  0x89   :  { %s2579_s3 = scalar_lea.vmem %s69_s26, 16  ;;  %s2583_s24 = scalar_lea.vmem %s69_s26, 32 }
  0x8a   :  { %p2580_p1 = scmp.ne.s32.totalorder %s69_s26, %s2579_s3  ;;  %p2584_p2 = scmp.lt.s32.totalorder %s69_s26, %s69_s26 }
  0x8b   :  { %p2585_p3 = scmp.lt.s32.totalorder %s2583_s24, %s2579_s3 }
  0x8d   :  { %p2586_p4 = por %p2585_p3, %p2584_p2 }
  0x8f   :  { %p2587_p5 = pnand %p2586_p4, %p2580_p1 }
  0x91   :  { %2590 = shalt.err (!%p2587_p5)
}
  0x92   :  { %71 = dma.hbm_to_vmem [thread:$0]  %s3521_s23, 16, %s69_s26, [#allocation6]  }
  0x93   :  { %s3522_s30 = sld [smem:[#allocation33_spill]] }
  0x99   :  { %s2591_s25 = scalar_lea.hbm %s3522_s30, 16 }
  0x9a   :  { %p2592_p6 = scmp.ne.s32.totalorder %s3522_s30, %s2591_s25  ;;  %p2595_p7 = scmp.lt.u32.totalorder %s2591_s25, %s3522_s30 }
  0x9c   :  { %p2597_p8 = pnand %p2595_p7, %p2592_p6 }
  0x9e   :  { %2600 = shalt.err (!%p2597_p8)
}
  0x9f   :  { %s2601_s6 = scalar_lea.vmem %s91_s28, 16  ;;  %s2605_s7 = scalar_lea.vmem %s91_s28, 32 }
  0xa0   :  { %p2602_p9 = scmp.ne.s32.totalorder %s91_s28, %s2601_s6  ;;  %p2606_p10 = scmp.lt.s32.totalorder %s91_s28, %s91_s28 }
  0xa1   :  { %p2607_p11 = scmp.lt.s32.totalorder %s2605_s7, %s2601_s6 }
  0xa3   :  { %p2608_p12 = por %p2607_p11, %p2606_p10 }
  0xa5   :  { %p2609_p13 = pnand %p2608_p12, %p2602_p9 }
  0xa7   :  { %2612 = shalt.err (!%p2609_p13)
}
  0xa8   :  { %93 = dma.hbm_to_vmem [thread:$0]  %s3522_s30, 16, %s91_s28, [#allocation9]  }
  0xa9   :  { %s2724_s5 = smov [#allocation13]   ;;  %s2725_s3 = smov [#allocation16]  }
  0xaa   :  { %s112_s22 = sshll.u32 %s2724_s5, 4  ;;  %s136_s24 = sshll.u32 %s2725_s3, 4  ;;  %s113_s22 = int_to_ptr.vmem [resolvable:$true] %s112_s22  ;;  %s137_s24 = int_to_ptr.vmem [resolvable:$true] %s136_s24 }
  0xab   :  { %s2613_s4 = scalar_lea.hbm %s3480_s8, 16 }
  0xac   :  { %p2614_p0 = scmp.ne.s32.totalorder %s3480_s8, %s2613_s4  ;;  %p2617_p1 = scmp.lt.u32.totalorder %s2613_s4, %s3480_s8 }
  0xae   :  { %p2619_p2 = pnand %p2617_p1, %p2614_p0 }
  0xb0   :  { %2622 = shalt.err (!%p2619_p2)
}
  0xb1   :  { %s2623_s28 = scalar_lea.vmem %s113_s22, 16  ;;  %s2627_s30 = scalar_lea.vmem %s113_s22, 32 }
  0xb2   :  { %p2624_p3 = scmp.ne.s32.totalorder %s113_s22, %s2623_s28  ;;  %p2628_p4 = scmp.lt.s32.totalorder %s113_s22, %s113_s22 }
  0xb3   :  { %p2629_p5 = scmp.lt.s32.totalorder %s2627_s30, %s2623_s28 }
  0xb5   :  { %p2630_p6 = por %p2629_p5, %p2628_p4 }
  0xb7   :  { %p2631_p7 = pnand %p2630_p6, %p2624_p3 }
  0xb9   :  { %2634 = shalt.err (!%p2631_p7)
}
  0xba   :  { %115 = dma.hbm_to_vmem [thread:$0]  %s3480_s8, 16, %s113_s22, [#allocation12]  }
  0xbb   :  { %s2635_s26 = scalar_lea.hbm %s3484_s12, 16 }
  0xbc   :  { %p2636_p8 = scmp.ne.s32.totalorder %s3484_s12, %s2635_s26  ;;  %p2639_p9 = scmp.lt.u32.totalorder %s2635_s26, %s3484_s12 }
  0xbe   :  { %p2641_p10 = pnand %p2639_p9, %p2636_p8 }
  0xc0   :  { %2644 = shalt.err (!%p2641_p10)
}
  0xc1   :  { %s2645_s0 = scalar_lea.vmem %s137_s24, 16  ;;  %s2649_s4 = scalar_lea.vmem %s137_s24, 32 }
  0xc2   :  { %p2646_p11 = scmp.ne.s32.totalorder %s137_s24, %s2645_s0  ;;  %p2650_p12 = scmp.lt.s32.totalorder %s137_s24, %s137_s24 }
  0xc3   :  { %p2651_p13 = scmp.lt.s32.totalorder %s2649_s4, %s2645_s0 }
  0xc5   :  { %p2652_p0 = por %p2651_p13, %p2650_p12 }
  0xc7   :  { %p2653_p1 = pnand %p2652_p0, %p2646_p11 }
  0xc9   :  { %2656 = shalt.err (!%p2653_p1)
}
  0xca   :  { %139 = dma.hbm_to_vmem [thread:$0]  %s3484_s12, 16, %s137_s24, [#allocation15]  }
  0xcb   :  { %2701 = dma.done.wait [#allocation3], 16  }
  0xcc   :  { %2702 = vsyncadd [#allocation3], 4294967280 }
  0xcd   :  { %2703 = dma.done.wait [#allocation6], 272  }
  0xce   :  { %2704 = vsyncadd [#allocation6], 4294967024 }
  0xcf   :  { %2705 = dma.done.wait [#allocation9], 272  }
  0xd0   :  { %2706 = vsyncadd [#allocation9], 4294967024 }
  0xd1   :  { %2707 = dma.done.wait [#allocation12], 272  }
  0xd2   :  { %2708 = vsyncadd [#allocation12], 4294967024 }
  0xd3   :  { %2709 = dma.done.wait [#allocation15], 80  }
  0xd4   :  { %2710 = vsyncadd [#allocation15], 4294967216  ;;  %vm196_vm0 = vcmask 261120   ;;  %s3523_s2 = sld [smem:[#allocation27_spill]]  ;;  %v2357_v56 = vld [vmem:[#allocation8] sm:$0xff]   ;;  %v2358_v57 = vld [vmem:[#allocation11] sm:$0xff]  }
  0xd5   :  { %2232 = vmatprep.subr.bf16.mxu0 %v2357_v56  ;;  %2244 = vmatprep.subr.bf16.mxu1 %v2358_v57  ;;  %v2359_v58 = vld [vmem:[#allocation8 + $0x8] sm:$0xff]   ;;  %v2360_v59 = vld [vmem:[#allocation11 + $0x8] sm:$0xff]   ;;  %v2726_v60 = vmov 0.0   ;;  %s3524_s8 = sld [smem:[#allocation28_spill]]  ;;  %vm590_vm1 = vcmask 1041409   ;;  %vm593_vm2 = vcmask 1042434  }
  0xd6   :  { %2233 = vmatpush3.bf16.msra.mxu0 %v2357_v56  ;;  %2245 = vmatpush3.bf16.msra.mxu1 %v2358_v57  ;;  %v2361_v56 = vld [vmem:[#allocation5] sm:$0xff]   ;;  %vm596_vm3 = vcmask 1043459   ;;  %vm599_vm4 = vcmask 1044484   ;;  %vm602_vm5 = vcmask 1045509   ;;  %vm605_vm6 = vcmask 1046534  }
  0xd7   :  { %2234 = vmatprep.subr.bf16.mxu0 %v2359_v58  ;;  %2246 = vmatprep.subr.bf16.mxu1 %v2360_v59  ;;  %vm608_vm7 = vcmask 1047559   ;;  %vm2727_vm8 = vmmov 0   ;;  %vm1055_vm9 = vcmask 1043456   ;;  %vm885_vm10 = vcmask 64512  }
  0xda   :  { %v186_v0 = vld [vmem:[%s3523_s2] sm:$0xff]  ;;  %v188_v1 = vld [vmem:[%s3523_s2 + $0x10] sm:$0xff]  ;;  %v187_v2 = vld [vmem:[%s3523_s2 + $0x8] sm:$0xff]  ;;  %2235 = vmatpush3.bf16.msra.mxu0 %v2359_v58  ;;  %2247 = vmatpush3.bf16.msra.mxu1 %v2360_v59 }
  0xdb   :  { %v197_v3 = vsel %vm196_vm0, %v186_v0, 0.0  ;;  %v203_v4 = vsel %vm196_vm0, %v188_v1, 0.0  ;;  %v189_v5 = vld [vmem:[%s3523_s2 + $0x18] sm:$0xff]  ;;  %v190_v6 = vld [vmem:[%s3523_s2 + $0x20] sm:$0xff]  ;;  %v191_v7 = vld [vmem:[%s3523_s2 + $0x28] sm:$0xff]  ;;  %v200_v8 = vsel %vm196_vm0, %v187_v2, 0.0  ;;  %2256 = vmatprep.subr.bf16.mxu0 %v2726_v60 }
  0xdc   :  { %198 = vadd.xlane.f32.xlu0 %v197_v3  ;;  %204 = vadd.xlane.f32.xlu1 %v203_v4  ;;  %v206_v9 = vsel %vm196_vm0, %v189_v5, 0.0  ;;  %v209_v10 = vsel %vm196_vm0, %v190_v6, 0.0  ;;  %v212_v11 = vsel %vm196_vm0, %v191_v7, 0.0  ;;  %v192_v12 = vld [vmem:[%s3523_s2 + $0x30] sm:$0xff]  ;;  %v193_v13 = vld [vmem:[%s3523_s2 + $0x38] sm:$0xff] }
  0xdd   :  { %v215_v14 = vsel %vm196_vm0, %v192_v12, 0.0  ;;  %v218_v15 = vsel %vm196_vm0, %v193_v13, 0.0 }
  0xe0   :  { %201 = vadd.xlane.f32.xlu0 %v200_v8  ;;  %207 = vadd.xlane.f32.xlu1 %v206_v9 }
  0xe4   :  { %210 = vadd.xlane.f32.xlu0 %v209_v10  ;;  %213 = vadd.xlane.f32.xlu1 %v212_v11 }
  0xe8   :  { %216 = vadd.xlane.f32.xlu0 %v215_v14  ;;  %219 = vadd.xlane.f32.xlu1 %v218_v15 }
 0x169   :  { %v199_v16 = vpop.xlane.xlu0 %198  ;;  %v205_v17 = vpop.xlane.xlu1 %204 }
 0x16a   :  { %v222_v18 = vmul.f32 0.03125, %v199_v16  ;;  %v224_v19 = vmul.f32 0.03125, %v205_v17 }
 0x16c   :  { %v3001_v20 = vsub.f32 %v186_v0, %v222_v18  ;;  %v3003_v21 = vsub.f32 %v188_v1, %v224_v19  ;;  %v3045_v19 = vld [vmem:[%s3524_s8] ss:$0 sm:$0xff] }
 0x16d   :  { %v202_v22 = vpop.xlane.xlu0 %201  ;;  %v208_v23 = vpop.xlane.xlu1 %207 }
 0x16e   :  { %v223_v24 = vmul.f32 0.03125, %v202_v22  ;;  %v225_v25 = vmul.f32 0.03125, %v208_v23  ;;  %v238_v26 = vmul.f32 %v3001_v20, %v3001_v20  ;;  %v240_v27 = vmul.f32 %v3003_v21, %v3003_v21 }
 0x170   :  { %v3009_v28 = vsub.f32 %v187_v2, %v223_v24  ;;  %v3011_v29 = vsub.f32 %v189_v5, %v225_v25  ;;  %v246_v30 = vsel %vm196_vm0, %v238_v26, 0.0  ;;  %v252_v33 = vsel %vm196_vm0, %v240_v27, 0.0  ;;  %v3048_v25 = vld [vmem:[#allocation2] ss:$0 sm:$0xff] }
 0x171   :  { %247 = vadd.xlane.f32.xlu0 %v246_v30  ;;  %v211_v31 = vpop.xlane.xlu0 %210  ;;  %v214_v32 = vpop.xlane.xlu1 %213 }
 0x172   :  { %v226_v34 = vmul.f32 0.03125, %v211_v31  ;;  %v227_v35 = vmul.f32 0.03125, %v214_v32  ;;  %v239_v36 = vmul.f32 %v3009_v28, %v3009_v28  ;;  %v241_v37 = vmul.f32 %v3011_v29, %v3011_v29 }
 0x174   :  { %v3019_v38 = vsub.f32 %v190_v6, %v226_v34  ;;  %v3021_v39 = vsub.f32 %v191_v7, %v227_v35  ;;  %v249_v40 = vsel %vm196_vm0, %v239_v36, 0.0  ;;  %v255_v43 = vsel %vm196_vm0, %v241_v37, 0.0 }
 0x175   :  { %253 = vadd.xlane.f32.xlu0 %v252_v33  ;;  %250 = vadd.xlane.f32.xlu1 %v249_v40  ;;  %v217_v41 = vpop.xlane.xlu0 %216  ;;  %v220_v42 = vpop.xlane.xlu1 %219 }
 0x176   :  { %v228_v44 = vmul.f32 0.03125, %v217_v41  ;;  %v229_v45 = vmul.f32 0.03125, %v220_v42  ;;  %v242_v46 = vmul.f32 %v3019_v38, %v3019_v38  ;;  %v243_v47 = vmul.f32 %v3021_v39, %v3021_v39 }
 0x178   :  { %v3029_v48 = vsub.f32 %v192_v12, %v228_v44  ;;  %v3031_v49 = vsub.f32 %v193_v13, %v229_v45  ;;  %v258_v50 = vsel %vm196_vm0, %v242_v46, 0.0  ;;  %v261_v51 = vsel %vm196_vm0, %v243_v47, 0.0 }
 0x179   :  { %256 = vadd.xlane.f32.xlu1 %v255_v43  ;;  %259 = vadd.xlane.f32.xlu0 %v258_v50 }
 0x17a   :  { %v244_v52 = vmul.f32 %v3029_v48, %v3029_v48  ;;  %v245_v53 = vmul.f32 %v3031_v49, %v3031_v49 }
 0x17c   :  { %v264_v54 = vsel %vm196_vm0, %v244_v52, 0.0  ;;  %v267_v55 = vsel %vm196_vm0, %v245_v53, 0.0 }
 0x17d   :  { %262 = vadd.xlane.f32.xlu1 %v261_v51  ;;  %265 = vadd.xlane.f32.xlu0 %v264_v54 }
 0x181   :  { %268 = vadd.xlane.f32.xlu1 %v267_v55 }
 0x1fe   :  { %v248_v61 = vpop.xlane.xlu0 %247 }
 0x1ff   :  { %v270_v62 = vmul.f32 0.03125, %v248_v61 }
 0x201   :  { %v278_v63 = vadd.f32 1e-06, %v270_v62 }
 0x202   :  { %v251_v0 = vpop.xlane.xlu1 %250  ;;  %v254_v1 = vpop.xlane.xlu0 %253 }
 0x203   :  { %2377 = vrsqrt.f32 %v278_v63  ;;  %v271_v2 = vmul.f32 0.03125, %v251_v0  ;;  %v272_v3 = vmul.f32 0.03125, %v254_v1 }
 0x205   :  { %v279_v4 = vadd.f32 1e-06, %v271_v2  ;;  %v280_v5 = vadd.f32 1e-06, %v272_v3 }
 0x206   :  { %v257_v6 = vpop.xlane.xlu1 %256  ;;  %v260_v7 = vpop.xlane.xlu0 %259 }
 0x207   :  { %2379 = vrsqrt.f32 %v279_v4  ;;  %v273_v8 = vmul.f32 0.03125, %v257_v6  ;;  %v274_v9 = vmul.f32 0.03125, %v260_v7  ;;  %v2362_v7 = vld [vmem:[#allocation5 + $0x8] sm:$0xff]  }
 0x208   :  { %2381 = vrsqrt.f32 %v280_v5 }
 0x209   :  { %v281_v10 = vadd.f32 1e-06, %v273_v8  ;;  %v282_v11 = vadd.f32 1e-06, %v274_v9 }
 0x20a   :  { %v263_v12 = vpop.xlane.xlu1 %262  ;;  %v266_v13 = vpop.xlane.xlu0 %265 }
 0x20b   :  { %2383 = vrsqrt.f32 %v281_v10  ;;  %v275_v14 = vmul.f32 0.03125, %v263_v12  ;;  %v276_v15 = vmul.f32 0.03125, %v266_v13 }
 0x20c   :  { %2385 = vrsqrt.f32 %v282_v11 }
 0x20d   :  { %v2378_v16 = vpop.eup %2377  ;;  %v283_v17 = vadd.f32 1e-06, %v275_v14  ;;  %v284_v18 = vadd.f32 1e-06, %v276_v15 }
 0x20e   :  { %v269_v22 = vpop.xlane.xlu1 %268  ;;  %v294_v23 = vmul.f32 %v2378_v16, %v3001_v20 }
 0x20f   :  { %2387 = vrsqrt.f32 %v283_v17  ;;  %v277_v24 = vmul.f32 0.03125, %v269_v22 }
 0x210   :  { %2389 = vrsqrt.f32 %v284_v18  ;;  %v308_v26 = vmul.f32 %v3045_v19, %v294_v23 }
 0x211   :  { %v2380_v27 = vpop.eup %2379  ;;  %v285_v30 = vadd.f32 1e-06, %v277_v24 }
 0x212   :  { %v2382_v31 = vpop.eup %2381  ;;  %v295_v32 = vmul.f32 %v2380_v27, %v3009_v28  ;;  %v322_v34 = vadd.f32 %v3048_v25, %v308_v26 }
 0x213   :  { %v296_v33 = vmul.f32 %v2382_v31, %v3003_v21  ;;  %2391 = vrsqrt.f32 %v285_v30 }
 0x214   :  { %v309_v35 = vmul.f32 %v3045_v19, %v295_v32  ;;  %v554_v43 = vpack.c.bf16 %v322_v34, %v322_v34 }
 0x215   :  { %v2384_v20 = vpop.eup %2383  ;;  %v310_v36 = vmul.f32 %v3045_v19, %v296_v33  ;;  %v2363_v33 = vld [vmem:[%s3481_s9] sm:$0xff]  }
 0x216   :  { %v2386_v37 = vpop.eup %2385  ;;  %v297_v40 = vmul.f32 %v2384_v20, %v3011_v29  ;;  %v323_v41 = vadd.f32 %v3048_v25, %v309_v35  ;;  %v581_v54 = vunpack.c.l.b16 %v554_v43  ;;  %2264 = vmatprep.subr.bf16.mxu1 %v2363_v33 }
 0x217   :  { %v298_v42 = vmul.f32 %v2386_v37, %v3019_v38  ;;  %v324_v28 = vadd.f32 %v3048_v25, %v310_v36 }
 0x218   :  { %v330_v44 = vpack.c.bf16 %v323_v41, %v322_v34  ;;  %v555_v21 = vpack.c.bf16 %v323_v41, %v323_v41  ;;  %v311_v45 = vmul.f32 %v3045_v19, %v297_v40  ;;  %v2364_v34 = vld [vmem:[%s3481_s9 + $0x8] sm:$0xff]   ;;  %s3525_s9 = sld [smem:[#allocation35_spill]] }
 0x219   :  { %v2388_v46 = vpop.eup %2387  ;;  %v556_v47 = vpack.c.bf16 %v324_v28, %v324_v28  ;;  %v312_v50 = vmul.f32 %v3045_v19, %v298_v42 }
 0x21a   :  { %v2390_v51 = vpop.eup %2389  ;;  %v299_v52 = vmul.f32 %v2388_v46, %v3021_v39  ;;  %2236 = vmatprep.mubr.msk.bf16.mxu0 %vm196_vm0, %v330_v44  ;;  %v582_v29 = vunpack.c.l.b16 %v555_v21  ;;  %2248 = vmatprep.mubr.msk.bf16.mxu1 %vm196_vm0, %v330_v44  ;;  %v325_v38 = vadd.f32 %v3048_v25, %v311_v45  ;;  %v671_v21 = vlaneseq }
 0x21b   :  { %v300_v53 = vmul.f32 %v2390_v51, %v3029_v48  ;;  %v583_v55 = vunpack.c.l.b16 %v556_v47  ;;  %v326_v57 = vadd.f32 %v3048_v25, %v312_v50 }
 0x21c   :  { %v589_v58 = vrot.slane %v582_v29, 7  ;;  %v331_v59 = vpack.c.bf16 %v325_v38, %v324_v28  ;;  %v557_v61 = vpack.c.bf16 %v325_v38, %v325_v38  ;;  %v313_v39 = vmul.f32 %v3045_v19, %v299_v52 }
 0x21d   :  { %v2392_v62 = vpop.eup %2391  ;;  %v592_v63 = vrot.slane %v583_v55, 6  ;;  %v558_v0 = vpack.c.bf16 %v326_v57, %v326_v57  ;;  %v314_v1 = vmul.f32 %v3045_v19, %v300_v53  ;;  %v2728_v28 = vmov 1966171168   ;;  %v2134_v55 = vld [vmem:[#allocation7] ss:$0 sm:$0xff] }
 0x21e   :  { %v301_v2 = vmul.f32 %v2392_v62, %v3031_v49  ;;  %v591_v48 = vsel %vm590_vm1, %v589_v58, %v581_v54  ;;  %2237 = vmatmul.mubr.msk.bf16.vlgmr.msra.gmra.mrb[0].mxu0 %vm196_vm0, %v331_v59  ;;  %v584_v3 = vunpack.c.l.b16 %v557_v61  ;;  %2249 = vmatmul.mubr.msk.bf16.vlgmr.msra.gmra.mrb[0].mxu1 %vm196_vm0, %v331_v59  ;;  %v327_v4 = vadd.f32 %v3048_v25, %v313_v39  ;;  %v2112_v39 = vld [vmem:[#allocation10] ss:$0 sm:$0xff] }
 0x21f   :  { %2257 = vmatpush3.bf16.msra.mxu0 %v2361_v56  ;;  %v585_v5 = vunpack.c.l.b16 %v558_v0  ;;  %v328_v6 = vadd.f32 %v3048_v25, %v314_v1  ;;  %v594_v11 = vsel %vm593_vm2, %v592_v63, %v591_v48  ;;  %2265 = vmatpush3.bf16.msra.mxu1 %v2363_v33  ;;  %v669_v44 = vunpack.c.l.s4 %v2728_v28 }
 0x220   :  { %v595_v8 = vrot.slane %v584_v3, 5  ;;  %v332_v9 = vpack.c.bf16 %v327_v4, %v326_v57  ;;  %v559_v10 = vpack.c.bf16 %v327_v4, %v327_v4  ;;  %2258 = vmatprep.subr.bf16.mxu0 %v2726_v60  ;;  %v315_v49 = vmul.f32 %v3045_v19, %v301_v2  ;;  %2266 = vmatprep.subr.bf16.mxu1 %v2364_v34 }
 0x221   :  { %v598_v12 = vrot.slane %v585_v5, 4  ;;  %v560_v13 = vpack.c.bf16 %v328_v6, %v328_v6  ;;  %v670_v53 = vunpack.c.0.s8 %v669_v44  ;;  %v672_v54 = vshrl.u32 %v671_v21, 7 }
 0x222   :  { %v597_v14 = vsel %vm596_vm3, %v595_v8, %v594_v11  ;;  %2240 = vmatprep.mubr.msk.bf16.mxu0 %vm196_vm0, %v332_v9  ;;  %v586_v15 = vunpack.c.l.b16 %v559_v10  ;;  %2252 = vmatprep.mubr.msk.bf16.mxu1 %vm196_vm0, %v332_v9  ;;  %v329_v16 = vadd.f32 %v3048_v25, %v315_v49 }
 0x223   :  { %v587_v17 = vunpack.c.l.b16 %v560_v13  ;;  %2259 = vmatpush3.bf16.msra.mxu0 %v2362_v7  ;;  %v600_v23 = vsel %vm599_vm4, %v598_v12, %v597_v14  ;;  %2267 = vmatpush3.bf16.msra.mxu1 %v2364_v34  ;;  %v673_v56 = vsub.s32 %v670_v53, %v672_v54  ;;  %v718_v1 = vsub.s32 0, %v672_v54 }
 0x224   :  { %v601_v18 = vrot.slane %v586_v15, 3  ;;  %v333_v22 = vpack.c.bf16 %v329_v16, %v328_v6  ;;  %v561_v19 = vpack.c.bf16 %v329_v16, %v329_v16  ;;  %2302 = vmatprep.subr.bf16.mxu1 %v2726_v60 }
 0x225   :  { %v604_v24 = vrot.slane %v587_v17, 2 }
 0x226   :  { %v603_v26 = vsel %vm602_vm5, %v601_v18, %v600_v23  ;;  %2241 = vmatmul.mubr.msk.bf16.gmra.mrb[4].mxu0 %vm196_vm0, %v333_v22  ;;  %v588_v27 = vunpack.c.l.b16 %v561_v19  ;;  %2253 = vmatmul.mubr.msk.bf16.gmra.mrb[4].mxu1 %vm196_vm0, %v333_v22 }
 0x227   :  { %2260 = vmatprep.mubr.msk.bf16.mxu0 %vm2727_vm8, %v2726_v60  ;;  %v606_v30 = vsel %vm605_vm6, %v604_v24, %v603_v26 }
 0x228   :  { %v607_v25 = vrot.slane %v588_v27, 1 }
 0x22a   :  { %v609_v31 = vsel %vm608_vm7, %v607_v25, %v606_v30 }
 0x22b   :  { %v610_v32 = vpack.c.b16 %v609_v31, %v609_v31 }
 0x22e   :  { %2261 = vmatmul.mubr.msk.bf16.vlgmr.msra.gmra.mrb[8].mxu0 %vm196_vm0, %v610_v32 }
 0x2f1   :  { %v2238_v35 = vpop.f32.mrb[0].mxu0  ;;  %v3099_v20 = vpop.f32.mrb[0].mxu1 }
 0x2f2   :  { %v403_v36 = vpop.f32.mrb[1].mxu0  ;;  %v3101_v37 = vpop.f32.mrb[1].mxu1  ;;  %v412_v4 = vadd.f32 %v2238_v35, %v2112_v39 }
 0x2f3   :  { %v2239_v40 = vpop.f32.mrb[2].mxu0  ;;  %v3103_v41 = vpop.f32.mrb[2].mxu1  ;;  %v404_v5 = vadd.f32 %v2112_v39, %v403_v36 }
 0x2f4   :  { %v406_v42 = vpop.f32.mrb[3].mxu0  ;;  %v3105_v43 = vpop.f32.mrb[3].mxu1  ;;  %v415_v6 = vadd.f32 %v2239_v40, %v2112_v39 }
 0x2f5   :  { %v407_v49 = vadd.f32 %v2112_v39, %v406_v42 }
 0x2f9   :  { %v2242_v45 = vpop.f32.mrb[4].mxu0  ;;  %v3107_v46 = vpop.f32.mrb[4].mxu1 }
 0x2fa   :  { %v419_v47 = vpop.f32.mrb[5].mxu0  ;;  %v3109_v50 = vpop.f32.mrb[5].mxu1  ;;  %v428_v11 = vadd.f32 %v2242_v45, %v2112_v39 }
 0x2fb   :  { %v2243_v51 = vpop.f32.mrb[6].mxu0  ;;  %v3111_v52 = vpop.f32.mrb[6].mxu1  ;;  %v420_v12 = vadd.f32 %v2112_v39, %v419_v47  ;;  %v1042_v47 = vld [vmem:[#allocation14] sm:$0xf] }
 0x2fc   :  { %v422_v29 = vpop.f32.mrb[7].mxu0  ;;  %v3113_v38 = vpop.f32.mrb[7].mxu1  ;;  %v431_v30 = vadd.f32 %v2243_v51, %v2112_v39  ;;  %2339 = vmatprep.subr.msk.bf16.mxu0 %vm1055_vm9, %v1042_v47  ;;  %v1057_v51 = vsel %vm1055_vm9, %v1042_v47, 0 }
 0x2fd   :  { %v423_v18 = vadd.f32 %v2112_v39, %v422_v29  ;;  %2277 = vmatpush3.bf16.msra.mxu0 %v1057_v51 }
 0x2fe   :  { %2286 = vmatprep.subr.bf16.mxu0 %v2726_v60 }
 0x301   :  { %v660_v57 = vpop.f32.mrb[8].mxu0 }
 0x302   :  { %v661_v58 = vadd.f32 %v2134_v55, %v660_v57  ;;  %v2262_v59 = vpop.f32.mrb[9].mxu0 }
 0x303   :  { %v663_v61 = vpop.f32.mrb[10].mxu0 }
 0x304   :  { %v667_v62 = vcombine.high %v661_v58, %v661_v58  ;;  %v674_v63 = vrot.slane %v661_v58, %v673_v56  ;;  %v2263_v0 = vpop.f32.mrb[11].mxu0 }
 0x306   :  { %v681_v2 = vrot.slane %v667_v62, %v673_v56  ;;  %v682_v48 = vcombine.high %v674_v63, %v674_v63  ;;  %v690_v3 = vrot.slane %v674_v63, %v673_v56 }
 0x308   :  { %v683_v7 = vcombine.high %v681_v2, %v681_v2  ;;  %v697_v8 = vrot.slane %v681_v2, %v673_v56  ;;  %v704_v9 = vrot.slane %v682_v48, %v673_v56  ;;  %v712_v10 = vcombine.high %v690_v3, %v690_v3 }
 0x309   :  { %v719_v13 = vrot.slane %v690_v3, %v718_v1 }
 0x30a   :  { %v711_v14 = vrot.slane %v683_v7, %v673_v56  ;;  %v713_v15 = vcombine.high %v697_v8, %v697_v8  ;;  %v714_v16 = vcombine.high %v704_v9, %v704_v9  ;;  %v723_v17 = vrot.slane %v704_v9, %v718_v1 }
 0x30b   :  { %v727_v22 = vrot.slane %v712_v10, %v718_v1  ;;  %v735_v19 = vrot.slane %v697_v8, %v718_v1  ;;  %v756_v23 = vmul.f32 %v719_v13, %v404_v5 }
 0x30c   :  { %v715_v24 = vcombine.high %v711_v14, %v711_v14  ;;  %v731_v26 = vrot.slane %v714_v16, %v718_v1  ;;  %v739_v27 = vrot.slane %v711_v14, %v718_v1  ;;  %v743_v25 = vrot.slane %v713_v15, %v718_v1 }
 0x30d   :  { %v758_v31 = vmul.f32 %v727_v22, %v412_v4  ;;  %v757_v32 = vmul.f32 %v723_v17, %v407_v49  ;;  %v760_v33 = vmul.f32 %v735_v19, %v420_v12 }
 0x30e   :  { %v759_v34 = vmul.f32 %v731_v26, %v415_v6  ;;  %v761_v35 = vmul.f32 %v739_v27, %v423_v18  ;;  %v747_v36 = vrot.slane %v715_v24, %v718_v1  ;;  %v762_v40 = vmul.f32 %v743_v25, %v428_v11 }
 0x30f   :  { %v2182_v42 = vpack.c.bf16 %v757_v32, %v756_v23 }
 0x310   :  { %v2183_v28 = vpack.c.bf16 %v759_v34, %v758_v31  ;;  %v2184_v44 = vpack.c.bf16 %v761_v35, %v760_v33  ;;  %v763_v21 = vmul.f32 %v747_v36, %v431_v30 }
 0x311   :  { %2268 = vmatprep.mubr.msk.bf16.mxu1 %vm196_vm0, %v2182_v42 }
 0x312   :  { %2269 = vmatmul.mubr.msk.bf16.vlgmr.msra.gmra.mrb[8].mxu1 %vm196_vm0, %v2183_v28  ;;  %v2185_v45 = vpack.c.bf16 %v763_v21, %v762_v40 }
 0x313   :  { %2272 = vmatprep.mubr.msk.bf16.mxu1 %vm196_vm0, %v2184_v44 }
 0x31a   :  { %2273 = vmatmul.mubr.msk.bf16.gmra.mrb[12].mxu1 %vm196_vm0, %v2185_v45 }
 0x31b   :  { %2318 = vmatprep.mubr.msk.bf16.mxu1 %vm2727_vm8, %v2726_v60 }
 0x3e5   :  { %v2270_v29 = vpop.f32.mrb[8].mxu1 }
 0x3e6   :  { %v900_v53 = vsel %vm885_vm10, %v2270_v29, -inf  ;;  %v854_v54 = vpop.f32.mrb[9].mxu1 }
 0x3e7   :  { %v901_v55 = vrot.slane %v900_v53, 4  ;;  %v886_v56 = vsel %vm885_vm10, %v854_v54, -inf  ;;  %v2271_v57 = vpop.f32.mrb[10].mxu1 }
 0x3e8   :  { %v887_v58 = vrot.slane %v886_v56, 4  ;;  %v907_v59 = vsel %vm885_vm10, %v2271_v57, -inf  ;;  %v857_v61 = vpop.f32.mrb[11].mxu1 }
 0x3e9   :  { %v902_v39 = vmax.f32 %v900_v53, %v901_v55  ;;  %v908_v62 = vrot.slane %v907_v59, 4  ;;  %v893_v63 = vsel %vm885_vm10, %v857_v61, -inf }
 0x3ea   :  { %v888_v0 = vmax.f32 %v886_v56, %v887_v58  ;;  %v894_v1 = vrot.slane %v893_v63, 4 }
 0x3eb   :  { %v903_v2 = vrot.slane %v902_v39, 2  ;;  %v909_v48 = vmax.f32 %v907_v59, %v908_v62 }
 0x3ec   :  { %v889_v3 = vrot.slane %v888_v0, 2  ;;  %v895_v4 = vmax.f32 %v893_v63, %v894_v1 }
 0x3ed   :  { %v904_v5 = vmax.f32 %v902_v39, %v903_v2  ;;  %v910_v6 = vrot.slane %v909_v48, 2  ;;  %v2274_v7 = vpop.f32.mrb[12].mxu1 }
 0x3ee   :  { %v890_v8 = vmax.f32 %v888_v0, %v889_v3  ;;  %v896_v9 = vrot.slane %v895_v4, 2  ;;  %v928_v10 = vsel %vm885_vm10, %v2274_v7, -inf  ;;  %v870_v49 = vpop.f32.mrb[13].mxu1 }
 0x3ef   :  { %v905_v11 = vrot.slane %v904_v5, 1  ;;  %v911_v12 = vmax.f32 %v909_v48, %v910_v6  ;;  %v929_v13 = vrot.slane %v928_v10, 4  ;;  %v914_v14 = vsel %vm885_vm10, %v870_v49, -inf  ;;  %v2275_v15 = vpop.f32.mrb[14].mxu1 }
 0x3f0   :  { %v891_v16 = vrot.slane %v890_v8, 1  ;;  %v897_v17 = vmax.f32 %v895_v4, %v896_v9  ;;  %v915_v18 = vrot.slane %v914_v14, 4  ;;  %v935_v22 = vsel %vm885_vm10, %v2275_v15, -inf  ;;  %v873_v19 = vpop.f32.mrb[15].mxu1 }
 0x3f1   :  { %v906_v23 = vmax.f32 %v904_v5, %v905_v11  ;;  %v912_v24 = vrot.slane %v911_v12, 1  ;;  %v930_v26 = vmax.f32 %v928_v10, %v929_v13  ;;  %v936_v27 = vrot.slane %v935_v22, 4 }
 0x3f2   :  { %v892_v25 = vmax.f32 %v890_v8, %v891_v16  ;;  %v898_v30 = vrot.slane %v897_v17, 1  ;;  %v916_v31 = vmax.f32 %v914_v14, %v915_v18  ;;  %v921_v32 = vsel %vm885_vm10, %v873_v19, -inf }
 0x3f3   :  { %v944_v33 = vsub.f32 %v2270_v29, %v906_v23  ;;  %v913_v34 = vmax.f32 %v911_v12, %v912_v24  ;;  %v931_v35 = vrot.slane %v930_v26, 2  ;;  %v937_v36 = vmax.f32 %v935_v22, %v936_v27 }
 0x3f4   :  { %v942_v40 = vsub.f32 %v854_v54, %v892_v25  ;;  %v899_v42 = vmax.f32 %v897_v17, %v898_v30  ;;  %v917_v28 = vrot.slane %v916_v31, 2  ;;  %v922_v44 = vrot.slane %v921_v32, 4 }
 0x3f5   :  { %v954_v21 = vmul.f32 1.442695, %v944_v33  ;;  %v945_v45 = vsub.f32 %v2271_v57, %v913_v34  ;;  %v932_v47 = vmax.f32 %v930_v26, %v931_v35  ;;  %v938_v51 = vrot.slane %v937_v36, 2 }
 0x3f6   :  { %v950_v53 = vmul.f32 1.442695, %v942_v40  ;;  %v943_v55 = vsub.f32 %v857_v61, %v899_v42  ;;  %v918_v56 = vmax.f32 %v916_v31, %v917_v28  ;;  %v923_v58 = vmax.f32 %v921_v32, %v922_v44 }
 0x3f7   :  { %2393 = vpow2.f32 %v954_v21  ;;  %v956_v59 = vmul.f32 1.442695, %v945_v45  ;;  %v933_v39 = vrot.slane %v932_v47, 1  ;;  %v939_v62 = vmax.f32 %v937_v36, %v938_v51 }
 0x3f8   :  { %2395 = vpow2.f32 %v950_v53  ;;  %v952_v29 = vmul.f32 1.442695, %v943_v55  ;;  %v919_v63 = vrot.slane %v918_v56, 1  ;;  %v924_v0 = vrot.slane %v923_v58, 2 }
 0x3f9   :  { %2397 = vpow2.f32 %v956_v59  ;;  %v934_v54 = vmax.f32 %v932_v47, %v933_v39  ;;  %v940_v1 = vrot.slane %v939_v62, 1 }
 0x3fa   :  { %2399 = vpow2.f32 %v952_v29  ;;  %v920_v2 = vmax.f32 %v918_v56, %v919_v63  ;;  %v925_v57 = vmax.f32 %v923_v58, %v924_v0 }
 0x3fb   :  { %v948_v48 = vsub.f32 %v2274_v7, %v934_v54  ;;  %v941_v3 = vmax.f32 %v939_v62, %v940_v1 }
 0x3fc   :  { %v946_v4 = vsub.f32 %v870_v49, %v920_v2  ;;  %v926_v61 = vrot.slane %v925_v57, 1 }
 0x3fd   :  { %v962_v5 = vmul.f32 1.442695, %v948_v48  ;;  %v949_v6 = vsub.f32 %v2275_v15, %v941_v3 }
 0x3fe   :  { %v958_v8 = vmul.f32 1.442695, %v946_v4  ;;  %v927_v9 = vmax.f32 %v925_v57, %v926_v61 }
 0x3ff   :  { %2401 = vpow2.f32 %v962_v5  ;;  %v964_v10 = vmul.f32 1.442695, %v949_v6 }
 0x400   :  { %2403 = vpow2.f32 %v958_v8  ;;  %v947_v11 = vsub.f32 %v873_v19, %v927_v9 }
 0x401   :  { %v3130_v12 = vpop.eup %2393  ;;  %2405 = vpow2.f32 %v964_v10 }
 0x402   :  { %v3132_v13 = vpop.eup %2395  ;;  %v980_v14 = vsel %vm885_vm10, %v3130_v12, 0.0  ;;  %v960_v7 = vmul.f32 1.442695, %v947_v11 }
 0x403   :  { %v3136_v16 = vpop.eup %2397  ;;  %v981_v49 = vrot.slane %v980_v14, 4  ;;  %v966_v15 = vsel %vm885_vm10, %v3132_v13, 0.0 }
 0x404   :  { %v3140_v17 = vpop.eup %2399  ;;  %v967_v18 = vrot.slane %v966_v15, 4  ;;  %v987_v22 = vsel %vm885_vm10, %v3136_v16, 0.0  ;;  %2407 = vpow2.f32 %v960_v7 }
 0x405   :  { %v982_v19 = vadd.f32 %v981_v49, %v980_v14  ;;  %v988_v23 = vrot.slane %v987_v22, 4  ;;  %v973_v24 = vsel %vm885_vm10, %v3140_v17, 0.0 }
 0x406   :  { %v968_v26 = vadd.f32 %v967_v18, %v966_v15  ;;  %v974_v27 = vrot.slane %v973_v24, 4 }
 0x407   :  { %v983_v25 = vrot.slane %v982_v19, 2  ;;  %v989_v30 = vadd.f32 %v988_v23, %v987_v22 }
 0x408   :  { %v969_v31 = vrot.slane %v968_v26, 2  ;;  %v975_v32 = vadd.f32 %v974_v27, %v973_v24 }
 0x409   :  { %v3146_v33 = vpop.eup %2401  ;;  %v984_v34 = vadd.f32 %v983_v25, %v982_v19  ;;  %v990_v35 = vrot.slane %v989_v30, 2 }
 0x40a   :  { %v3148_v36 = vpop.eup %2403  ;;  %v970_v40 = vadd.f32 %v969_v31, %v968_v26  ;;  %v976_v42 = vrot.slane %v975_v32, 2  ;;  %v1008_v28 = vsel %vm885_vm10, %v3146_v33, 0.0 }
 0x40b   :  { %v2406_v44 = vpop.eup %2405  ;;  %v985_v21 = vrot.slane %v984_v34, 1  ;;  %v991_v45 = vadd.f32 %v990_v35, %v989_v30  ;;  %v1009_v47 = vrot.slane %v1008_v28, 4  ;;  %v994_v51 = vsel %vm885_vm10, %v3148_v36, 0.0 }
 0x40c   :  { %v971_v53 = vrot.slane %v970_v40, 1  ;;  %v977_v55 = vadd.f32 %v976_v42, %v975_v32  ;;  %v995_v56 = vrot.slane %v994_v51, 4  ;;  %v1015_v58 = vsel %vm885_vm10, %v2406_v44, 0.0 }
 0x40d   :  { %v986_v59 = vadd.f32 %v985_v21, %v984_v34  ;;  %v992_v39 = vrot.slane %v991_v45, 1  ;;  %v1010_v62 = vadd.f32 %v1009_v47, %v1008_v28  ;;  %v1016_v29 = vrot.slane %v1015_v58, 4 }
 0x40e   :  { %v2408_v63 = vpop.eup %2407  ;;  %v972_v0 = vadd.f32 %v971_v53, %v970_v40  ;;  %v978_v54 = vrot.slane %v977_v55, 1  ;;  %v996_v1 = vadd.f32 %v995_v56, %v994_v51 }
 0x40f   :  { %2409 = vrcp.f32 %v986_v59  ;;  %v993_v2 = vadd.f32 %v992_v39, %v991_v45  ;;  %v1011_v57 = vrot.slane %v1010_v62, 2  ;;  %v1017_v48 = vadd.f32 %v1016_v29, %v1015_v58 }
 0x410   :  { %2411 = vrcp.f32 %v972_v0  ;;  %v979_v3 = vadd.f32 %v978_v54, %v977_v55  ;;  %v997_v4 = vrot.slane %v996_v1, 2  ;;  %v1001_v61 = vsel %vm885_vm10, %v2408_v63, 0.0 }
 0x411   :  { %2413 = vrcp.f32 %v993_v2  ;;  %v1012_v5 = vadd.f32 %v1011_v57, %v1010_v62  ;;  %v1018_v6 = vrot.slane %v1017_v48, 2  ;;  %v1002_v8 = vrot.slane %v1001_v61, 4 }
 0x412   :  { %2415 = vrcp.f32 %v979_v3  ;;  %v998_v9 = vadd.f32 %v997_v4, %v996_v1 }
 0x413   :  { %v1013_v10 = vrot.slane %v1012_v5, 1  ;;  %v1019_v11 = vadd.f32 %v1018_v6, %v1017_v48  ;;  %v1003_v14 = vadd.f32 %v1002_v8, %v1001_v61 }
 0x414   :  { %v999_v7 = vrot.slane %v998_v9, 1 }
 0x415   :  { %v1014_v49 = vadd.f32 %v1013_v10, %v1012_v5  ;;  %v1020_v15 = vrot.slane %v1019_v11, 1  ;;  %v1004_v18 = vrot.slane %v1003_v14, 2 }
 0x416   :  { %v1000_v22 = vadd.f32 %v999_v7, %v998_v9 }
 0x417   :  { %2417 = vrcp.f32 %v1014_v49  ;;  %v1021_v19 = vadd.f32 %v1020_v15, %v1019_v11  ;;  %v1005_v23 = vadd.f32 %v1004_v18, %v1003_v14 }
 0x419   :  { %v2410_v24 = vpop.eup %2409  ;;  %2419 = vrcp.f32 %v1021_v19  ;;  %v1006_v26 = vrot.slane %v1005_v23, 1 }
 0x41a   :  { %v2412_v27 = vpop.eup %2411  ;;  %2421 = vrcp.f32 %v1000_v22  ;;  %v1032_v32 = vmul.f32 %v2410_v24, %v3130_v12 }
 0x41b   :  { %v2414_v25 = vpop.eup %2413  ;;  %v1007_v30 = vadd.f32 %v1006_v26, %v1005_v23  ;;  %v1030_v35 = vmul.f32 %v2412_v27, %v3132_v13 }
 0x41c   :  { %v2416_v31 = vpop.eup %2415  ;;  %v1033_v34 = vmul.f32 %v2414_v25, %v3136_v16 }
 0x41d   :  { %2423 = vrcp.f32 %v1007_v30  ;;  %v1031_v40 = vmul.f32 %v2416_v31, %v3140_v17  ;;  %v2365_v17 = vld [vmem:[%s3483_s11] sm:$0xff]  }
 0x41e   :  { %v1039_v42 = vpack.c.bf16 %v1033_v34, %v1032_v32 }
 0x41f   :  { %v1038_v28 = vpack.c.bf16 %v1031_v40, %v1030_v35 }
 0x421   :  { %v2418_v21 = vpop.eup %2417  ;;  %2278 = vmatprep.mubr.msk.bf16.mxu0 %vm885_vm10, %v1038_v28 }
 0x422   :  { %2279 = vmatmul.mubr.msk.bf16.vlgmr.msra.gmra.mrb[12].mxu0 %vm885_vm10, %v1039_v42  ;;  %v1036_v47 = vmul.f32 %v2418_v21, %v3146_v33  ;;  %v2366_v33 = vld [vmem:[%s3483_s11 + $0x8] sm:$0xff]   ;;  %s2730_s11 = smov [#allocation18]  }
 0x423   :  { %v2420_v45 = vpop.eup %2419  ;;  %2287 = vmatpush3.bf16.msra.mxu0 %v2365_v17  ;;  %s2093_s30 = sshll.u32 %s2730_s11, 4  ;;  %s2094_s30 = int_to_ptr.vmem [resolvable:$true] %s2093_s30 }
 0x424   :  { %v1037_v51 = vmul.f32 %v2420_v45, %v2406_v44  ;;  %v2422_v53 = vpop.eup %2421  ;;  %2288 = vmatprep.subr.bf16.mxu0 %v2726_v60  ;;  %s2657_s1 = scalar_lea.vmem %s2094_s30, 128  ;;  %p2662_p3 = scmp.lt.s32.totalorder %s2094_s30, %s2094_s30 }
 0x425   :  { %v1034_v16 = vmul.f32 %v2422_v53, %v3148_v36  ;;  %v2119_v36 = vld [vmem:[#allocation13] ss:$0 sm:$0xff]  ;;  %p2658_p2 = scmp.ne.s32.totalorder %s2094_s30, %s2657_s1  ;;  %p2663_p4 = scmp.lt.s32.totalorder %s2657_s1, %s2657_s1 }
 0x426   :  { %v1041_v12 = vpack.c.bf16 %v1037_v51, %v1036_v47  ;;  %v500_v44 = vadd.f32 %v3099_v20, %v2119_v36  ;;  %v492_v58 = vadd.f32 %v2119_v36, %v3101_v37  ;;  %v503_v59 = vadd.f32 %v3103_v41, %v2119_v36 }
 0x427   :  { %v2424_v55 = vpop.eup %2423  ;;  %2289 = vmatpush3.bf16.msra.mxu0 %v2366_v33  ;;  %v495_v39 = vadd.f32 %v2119_v36, %v3105_v43  ;;  %v516_v61 = vadd.f32 %v3107_v46, %v2119_v36  ;;  %v508_v37 = vadd.f32 %v2119_v36, %v3109_v50  ;;  %v519_v8 = vadd.f32 %v3111_v52, %v2119_v36  ;;  %p2664_p5 = por %p2663_p4, %p2662_p3 }
 0x428   :  { %v1035_v56 = vmul.f32 %v2424_v55, %v2408_v63  ;;  %2294 = vmatprep.subr.bf16.mxu0 %v2726_v60  ;;  %v2176_v62 = vpack.c.bf16 %v500_v44, %v500_v44  ;;  %v2174_v29 = vpack.c.bf16 %v492_v58, %v492_v58  ;;  %v2177_v63 = vpack.c.bf16 %v503_v59, %v503_v59 }
 0x429   :  { %v2175_v0 = vpack.c.bf16 %v495_v39, %v495_v39  ;;  %v2180_v49 = vpack.c.bf16 %v516_v61, %v516_v61  ;;  %v2178_v22 = vpack.c.bf16 %v508_v37, %v508_v37  ;;  %v511_v50 = vadd.f32 %v2119_v36, %v3113_v38  ;;  %p2665_p6 = pnand %p2664_p5, %p2658_p2 }
 0x42a   :  { %v1040_v13 = vpack.c.bf16 %v1035_v56, %v1034_v16  ;;  %v1126_v54 = vunpack.c.l.bf16 %v2176_v62  ;;  %v1124_v1 = vunpack.c.l.bf16 %v2174_v29  ;;  %v1127_v57 = vunpack.c.l.bf16 %v2177_v63 }
 0x42b   :  { %v1125_v4 = vunpack.c.l.bf16 %v2175_v0  ;;  %v2181_v24 = vpack.c.bf16 %v519_v8, %v519_v8  ;;  %v1130_v30 = vunpack.c.l.bf16 %v2180_v49  ;;  %v1128_v34 = vunpack.c.l.bf16 %v2178_v22 }
 0x42c   :  { %2282 = vmatprep.mubr.msk.bf16.mxu0 %vm885_vm10, %v1040_v13  ;;  %v2179_v35 = vpack.c.bf16 %v511_v50, %v511_v50 }
 0x42d   :  { %2283 = vmatmul.mubr.msk.bf16.gmra.mrb[16].mxu0 %vm885_vm10, %v1041_v12  ;;  %v1131_v21 = vunpack.c.l.bf16 %v2181_v24 }
 0x42e   :  { %2290 = vmatprep.mubr.msk.bf16.mxu0 %vm2727_vm8, %v2726_v60  ;;  %v1129_v62 = vunpack.c.l.bf16 %v2179_v35 }
 0x4f5   :  { %v2280_v2 = vpop.f32.mrb[12].mxu0 }
 0x4f6   :  { %v1134_v48 = vmul.f32 %v2280_v2, %v1126_v54  ;;  %v1093_v3 = vpop.f32.mrb[13].mxu0 }
 0x4f7   :  { %v1132_v20 = vmul.f32 %v1124_v1, %v1093_v3  ;;  %v2281_v5 = vpop.f32.mrb[14].mxu0 }
 0x4f8   :  { %v1154_v41 = vsel %vm196_vm0, %v1134_v48, 0.0  ;;  %v1135_v43 = vmul.f32 %v2281_v5, %v1127_v57  ;;  %v1096_v6 = vpop.f32.mrb[15].mxu0 }
 0x4f9   :  { %v1155_v9 = vrot.slane %v1154_v41, 4  ;;  %v1140_v10 = vsel %vm196_vm0, %v1132_v20, 0.0  ;;  %v1133_v11 = vmul.f32 %v1125_v4, %v1096_v6 }
 0x4fa   :  { %v1141_v14 = vrot.slane %v1140_v10, 4  ;;  %v1161_v7 = vsel %vm196_vm0, %v1135_v43, 0.0 }
 0x4fb   :  { %v1156_v15 = vadd.f32 %v1155_v9, %v1154_v41  ;;  %v1162_v46 = vrot.slane %v1161_v7, 4  ;;  %v1147_v18 = vsel %vm196_vm0, %v1133_v11, 0.0 }
 0x4fc   :  { %v1142_v19 = vadd.f32 %v1141_v14, %v1140_v10  ;;  %v1148_v23 = vrot.slane %v1147_v18, 4 }
 0x4fd   :  { %v1157_v26 = vrot.slane %v1156_v15, 2  ;;  %v1163_v52 = vadd.f32 %v1162_v46, %v1161_v7 }
 0x4fe   :  { %v1143_v27 = vrot.slane %v1142_v19, 2  ;;  %v1149_v25 = vadd.f32 %v1148_v23, %v1147_v18 }
 0x4ff   :  { %v1158_v31 = vadd.f32 %v1157_v26, %v1156_v15  ;;  %v1164_v32 = vrot.slane %v1163_v52, 2 }
 0x500   :  { %v1144_v40 = vadd.f32 %v1143_v27, %v1142_v19  ;;  %v1150_v42 = vrot.slane %v1149_v25, 2  ;;  %v2284_v28 = vpop.f32.mrb[16].mxu0 }
 0x501   :  { %v1159_v45 = vrot.slane %v1158_v31, 1  ;;  %v1165_v47 = vadd.f32 %v1164_v32, %v1163_v52  ;;  %v1138_v51 = vmul.f32 %v2284_v28, %v1130_v30  ;;  %v1109_v38 = vpop.f32.mrb[17].mxu0 }
 0x502   :  { %v1145_v53 = vrot.slane %v1144_v40, 1  ;;  %v1151_v12 = vadd.f32 %v1150_v42, %v1149_v25  ;;  %v1136_v55 = vmul.f32 %v1128_v34, %v1109_v38  ;;  %v2285_v16 = vpop.f32.mrb[18].mxu0 }
 0x503   :  { %v1160_v56 = vadd.f32 %v1159_v45, %v1158_v31  ;;  %v1166_v13 = vrot.slane %v1165_v47, 1  ;;  %v1182_v17 = vsel %vm196_vm0, %v1138_v51, 0.0  ;;  %v1139_v33 = vmul.f32 %v2285_v16, %v1131_v21  ;;  %v1112_v36 = vpop.f32.mrb[19].mxu0 }
 0x504   :  { %v1146_v44 = vadd.f32 %v1145_v53, %v1144_v40  ;;  %v1152_v58 = vrot.slane %v1151_v12, 1  ;;  %v1183_v59 = vrot.slane %v1182_v17, 4  ;;  %v1168_v39 = vsel %vm196_vm0, %v1136_v55, 0.0 }
 0x505   :  { %v1167_v29 = vadd.f32 %v1166_v13, %v1165_v47  ;;  %v1169_v63 = vrot.slane %v1168_v39, 4  ;;  %v1189_v0 = vsel %vm196_vm0, %v1139_v33, 0.0  ;;  %v1198_v48 = vpack.c.bf16 %v1160_v56, %v1160_v56 }
 0x506   :  { %v1196_v54 = vpack.c.bf16 %v1146_v44, %v1146_v44  ;;  %v1153_v1 = vadd.f32 %v1152_v58, %v1151_v12  ;;  %v1184_v2 = vadd.f32 %v1183_v59, %v1182_v17  ;;  %v1190_v57 = vrot.slane %v1189_v0, 4  ;;  %v2451_v44 = vld [vmem:[%s3523_s2] sm:$0xff] }
 0x507   :  { %v1170_v3 = vadd.f32 %v1169_v63, %v1168_v39  ;;  %v1137_v4 = vmul.f32 %v1129_v62, %v1112_v36  ;;  %v1199_v61 = vpack.c.bf16 %v1167_v29, %v1167_v29  ;;  %v1218_v14 = vunpack.c.l.b16 %v1198_v48  ;;  %v2452_v63 = vld [vmem:[%s3523_s2 + $0x8] sm:$0xff] }
 0x508   :  { %v1197_v20 = vpack.c.bf16 %v1153_v1, %v1153_v1  ;;  %v1185_v5 = vrot.slane %v1184_v2, 2  ;;  %v1191_v37 = vadd.f32 %v1190_v57, %v1189_v0  ;;  %v1216_v41 = vunpack.c.l.b16 %v1196_v54  ;;  %v2453_v54 = vld [vmem:[%s3523_s2 + $0x10] sm:$0xff]  ;;  %v2454_v57 = vld [vmem:[%s3523_s2 + $0x18] sm:$0xff] }
 0x509   :  { %v1171_v43 = vrot.slane %v1170_v3, 2  ;;  %v1175_v6 = vsel %vm196_vm0, %v1137_v4, 0.0  ;;  %v1219_v49 = vunpack.c.l.b16 %v1199_v61  ;;  %v2155_v61 = vld [vmem:[#allocation16] ss:$0 sm:$0xff] }
 0x50a   :  { %v1217_v8 = vunpack.c.l.b16 %v1197_v20  ;;  %v1186_v9 = vadd.f32 %v1185_v5, %v1184_v2  ;;  %v1192_v10 = vrot.slane %v1191_v37, 2  ;;  %v1176_v11 = vrot.slane %v1175_v6, 4  ;;  %v2456_v20 = vld [vmem:[%s3523_s2 + $0x28] sm:$0xff] }
 0x50b   :  { %v1172_v7 = vadd.f32 %v1171_v43, %v1170_v3  ;;  %v2455_v3 = vld [vmem:[%s3523_s2 + $0x20] sm:$0xff] }
 0x50c   :  { %v1224_v15 = vsel %vm590_vm1, %v1217_v8, %v1216_v41  ;;  %v1193_v46 = vadd.f32 %v1192_v10, %v1191_v37  ;;  %v1177_v18 = vadd.f32 %v1176_v11, %v1175_v6  ;;  %v1187_v50 = vrot.slane %v1186_v9, 1  ;;  %v2457_v37 = vld [vmem:[%s3523_s2 + $0x30] sm:$0xff]  ;;  %v2458_v6 = vld [vmem:[%s3523_s2 + $0x38] sm:$0xff] }
 0x50d   :  { %v1225_v22 = vsel %vm593_vm2, %v1218_v14, %v1224_v15  ;;  %v1173_v19 = vrot.slane %v1172_v7, 1 }
 0x50e   :  { %v1226_v23 = vsel %vm596_vm3, %v1219_v49, %v1225_v22  ;;  %v1194_v24 = vrot.slane %v1193_v46, 1  ;;  %v1178_v26 = vrot.slane %v1177_v18, 2  ;;  %v1188_v25 = vadd.f32 %v1187_v50, %v1186_v9 }
 0x50f   :  { %v1174_v52 = vadd.f32 %v1173_v19, %v1172_v7 }
 0x510   :  { %v1179_v27 = vadd.f32 %v1178_v26, %v1177_v18  ;;  %v1195_v31 = vadd.f32 %v1194_v24, %v1193_v46  ;;  %v1202_v40 = vpack.c.bf16 %v1188_v25, %v1188_v25 }
 0x511   :  { %v1200_v30 = vpack.c.bf16 %v1174_v52, %v1174_v52 }
 0x512   :  { %v1180_v32 = vrot.slane %v1179_v27, 1  ;;  %v1203_v28 = vpack.c.bf16 %v1195_v31, %v1195_v31  ;;  %v1222_v47 = vunpack.c.l.b16 %v1202_v40 }
 0x513   :  { %v1220_v34 = vunpack.c.l.b16 %v1200_v30 }
 0x514   :  { %v1181_v35 = vadd.f32 %v1180_v32, %v1179_v27  ;;  %v1223_v51 = vunpack.c.l.b16 %v1203_v28 }
 0x515   :  { %v1227_v42 = vsel %vm599_vm4, %v1220_v34, %v1226_v23 }
 0x516   :  { %v1201_v21 = vpack.c.bf16 %v1181_v35, %v1181_v35 }
 0x518   :  { %v1221_v45 = vunpack.c.l.b16 %v1201_v21 }
 0x51a   :  { %v1228_v38 = vsel %vm602_vm5, %v1221_v45, %v1227_v42 }
 0x51b   :  { %v1229_v53 = vsel %vm605_vm6, %v1222_v47, %v1228_v38 }
 0x51c   :  { %v1230_v12 = vsel %vm608_vm7, %v1223_v51, %v1229_v53 }
 0x51d   :  { %v1231_v55 = vpack.c.b16 %v1230_v12, %v1230_v12 }
 0x51f   :  { %2291 = vmatmul.mubr.msk.bf16.vlgmr.msra.gmra.mrb[20].mxu0 %vm196_vm0, %v1231_v55 }
 0x520   :  { %2298 = vmatprep.mubr.msk.bf16.mxu0 %vm2727_vm8, %v2726_v60 }
 0x5f2   :  { %v1281_v16 = vpop.f32.mrb[20].mxu0 }
 0x5f3   :  { %v1288_v56 = vrot.slane %v1281_v16, 1  ;;  %v1289_v13 = vrot.slane %v1281_v16, 2  ;;  %v1290_v17 = vrot.slane %v1281_v16, 3  ;;  %v1291_v33 = vrot.slane %v1281_v16, 4  ;;  %v2292_v36 = vpop.f32.mrb[21].mxu0 }
 0x5f4   :  { %v1303_v58 = vadd.f32 %v2451_v44, %v1281_v16  ;;  %v1284_v59 = vpop.f32.mrb[22].mxu0  ;;  %v1292_v39 = vrot.slane %v1281_v16, 5  ;;  %v1293_v62 = vrot.slane %v1281_v16, 6  ;;  %v1294_v29 = vrot.slane %v1281_v16, 7 }
 0x5f5   :  { %v1304_v0 = vadd.f32 %v2452_v63, %v1288_v56  ;;  %v1305_v1 = vadd.f32 %v2453_v54, %v1289_v13  ;;  %v2293_v2 = vpop.f32.mrb[23].mxu0  ;;  %v1306_v48 = vadd.f32 %v2454_v57, %v1290_v17  ;;  %v1307_v4 = vadd.f32 %v2455_v3, %v1291_v33 }
 0x5f6   :  { %v1308_v5 = vadd.f32 %v2456_v20, %v1292_v39  ;;  %v1309_v41 = vadd.f32 %v2457_v37, %v1293_v62  ;;  %v1310_v8 = vadd.f32 %v2458_v6, %v1294_v29  ;;  %v3234_v14 = vadd.f32 %v2155_v61, %v1303_v58 }
 0x5f7   :  { %v3223_v43 = vadd.f32 %v2155_v61, %v1304_v0  ;;  %v3228_v9 = vadd.f32 %v2155_v61, %v1305_v1  ;;  %v3230_v10 = vadd.f32 %v2155_v61, %v1306_v48  ;;  %v3232_v11 = vadd.f32 %v2155_v61, %v1307_v4 }
 0x5f8   :  { %v3236_v7 = vadd.f32 %v2155_v61, %v1308_v5  ;;  %v3240_v46 = vadd.f32 %v2155_v61, %v1309_v41  ;;  %v3242_v18 = vadd.f32 %v2155_v61, %v1310_v8 }
 0x5f9   :  { %v1336_v49 = vrot.slane %v3223_v43, 7  ;;  %v1338_v15 = vrot.slane %v3228_v9, 6  ;;  %v1340_v50 = vrot.slane %v3230_v10, 5  ;;  %v1342_v23 = vrot.slane %v3232_v11, 4 }
 0x5fa   :  { %v1344_v26 = vrot.slane %v3236_v7, 3  ;;  %v1346_v27 = vrot.slane %v3240_v46, 2  ;;  %v1348_v30 = vrot.slane %v3242_v18, 1 }
 0x5fb   :  { %v1337_v22 = vsel %vm590_vm1, %v1336_v49, %v3234_v14  ;;  %v2367_v49 = vld [vmem:[%s3487_s15] sm:$0xff]  }
 0x5fc   :  { %v1339_v19 = vsel %vm593_vm2, %v1338_v15, %v1337_v22  ;;  %2295 = vmatpush3.bf16.msra.mxu0 %v2367_v49  ;;  %v2368_v15 = vld [vmem:[%s3487_s15 + $0x8] sm:$0xff]  }
 0x5fd   :  { %v1341_v24 = vsel %vm596_vm3, %v1340_v50, %v1339_v19  ;;  %2296 = vmatprep.subr.bf16.mxu0 %v2726_v60 }
 0x5fe   :  { %v1343_v52 = vsel %vm599_vm4, %v1342_v23, %v1341_v24  ;;  %v2156_v24 = vld [vmem:[%s3485_s13] ss:$0 sm:$0xff] }
 0x5ff   :  { %v1345_v25 = vsel %vm602_vm5, %v1344_v26, %v1343_v52 }
 0x600   :  { %v1347_v31 = vsel %vm605_vm6, %v1346_v27, %v1345_v25  ;;  %2297 = vmatpush3.bf16.msra.mxu0 %v2368_v15 }
 0x601   :  { %v1349_v32 = vsel %vm608_vm7, %v1348_v30, %v1347_v31 }
 0x602   :  { %v1351_v34 = vsel %vm196_vm0, %v1349_v32, 0.0 }
 0x603   :  { %1352 = vadd.xlane.f32.xlu0 %v1351_v34 }
 0x690   :  { %v1353_v35 = vpop.xlane.xlu0 %1352 }
 0x691   :  { %v1354_v40 = vmul.f32 0.03125, %v1353_v35  ;;  %v2157_v35 = vld [vmem:[%s3486_s14] ss:$0 sm:$0xff] }
 0x693   :  { %v1356_v42 = vrot.slane %v1354_v40, 1  ;;  %v1357_v28 = vrot.slane %v1354_v40, 2  ;;  %v1358_v21 = vrot.slane %v1354_v40, 3  ;;  %v1359_v45 = vrot.slane %v1354_v40, 4 }
 0x694   :  { %v1360_v47 = vrot.slane %v1354_v40, 5  ;;  %v1361_v51 = vrot.slane %v1354_v40, 6  ;;  %v1362_v38 = vrot.slane %v1354_v40, 7  ;;  %v1371_v53 = vsub.f32 %v3234_v14, %v1354_v40 }
 0x695   :  { %v1372_v12 = vsub.f32 %v3223_v43, %v1356_v42  ;;  %v1373_v55 = vsub.f32 %v3228_v9, %v1357_v28  ;;  %v1374_v16 = vsub.f32 %v3230_v10, %v1358_v21  ;;  %v1375_v56 = vsub.f32 %v3232_v11, %v1359_v45 }
 0x696   :  { %v1376_v13 = vsub.f32 %v3236_v7, %v1360_v47  ;;  %v1377_v17 = vsub.f32 %v3240_v46, %v1361_v51  ;;  %v1378_v33 = vsub.f32 %v3242_v18, %v1362_v38  ;;  %v1379_v39 = vmul.f32 %v1371_v53, %v1371_v53 }
 0x697   :  { %v1380_v36 = vmul.f32 %v1372_v12, %v1372_v12  ;;  %v1381_v44 = vmul.f32 %v1373_v55, %v1373_v55  ;;  %v1382_v58 = vmul.f32 %v1374_v16, %v1374_v16  ;;  %v1383_v59 = vmul.f32 %v1375_v56, %v1375_v56 }
 0x698   :  { %v1384_v62 = vmul.f32 %v1376_v13, %v1376_v13  ;;  %v1385_v0 = vmul.f32 %v1377_v17, %v1377_v17  ;;  %v1386_v54 = vmul.f32 %v1378_v33, %v1378_v33 }
 0x699   :  { %v1395_v29 = vrot.slane %v1380_v36, 7  ;;  %v1397_v63 = vrot.slane %v1381_v44, 6  ;;  %v1399_v2 = vrot.slane %v1382_v58, 5  ;;  %v1401_v48 = vrot.slane %v1383_v59, 4 }
 0x69a   :  { %v1403_v4 = vrot.slane %v1384_v62, 3  ;;  %v1405_v20 = vrot.slane %v1385_v0, 2  ;;  %v1407_v37 = vrot.slane %v1386_v54, 1 }
 0x69b   :  { %v1396_v1 = vsel %vm590_vm1, %v1395_v29, %v1379_v39 }
 0x69c   :  { %v1398_v57 = vsel %vm593_vm2, %v1397_v63, %v1396_v1 }
 0x69d   :  { %v1400_v3 = vsel %vm596_vm3, %v1399_v2, %v1398_v57 }
 0x69e   :  { %v1402_v61 = vsel %vm599_vm4, %v1401_v48, %v1400_v3 }
 0x69f   :  { %v1404_v5 = vsel %vm602_vm5, %v1403_v4, %v1402_v61 }
 0x6a0   :  { %v1406_v41 = vsel %vm605_vm6, %v1405_v20, %v1404_v5 }
 0x6a1   :  { %v1408_v6 = vsel %vm608_vm7, %v1407_v37, %v1406_v41 }
 0x6a2   :  { %v1410_v8 = vsel %vm196_vm0, %v1408_v6, 0.0 }
 0x6a3   :  { %1411 = vadd.xlane.f32.xlu1 %v1410_v8 }
 0x730   :  { %v1412_v22 = vpop.xlane.xlu1 %1411 }
 0x731   :  { %v1413_v50 = vmul.f32 0.03125, %v1412_v22 }
 0x733   :  { %v1414_v19 = vadd.f32 1e-06, %v1413_v50 }
 0x735   :  { %2425 = vrsqrt.f32 %v1414_v19 }
 0x73f   :  { %v2426_v23 = vpop.eup %2425 }
 0x740   :  { %v1417_v26 = vrot.slane %v2426_v23, 1  ;;  %v1418_v52 = vrot.slane %v2426_v23, 2  ;;  %v1419_v27 = vrot.slane %v2426_v23, 3  ;;  %v1420_v25 = vrot.slane %v2426_v23, 4 }
 0x741   :  { %v1421_v30 = vrot.slane %v2426_v23, 5  ;;  %v1422_v31 = vrot.slane %v2426_v23, 6  ;;  %v1423_v32 = vrot.slane %v2426_v23, 7  ;;  %v1432_v34 = vmul.f32 %v2426_v23, %v1371_v53 }
 0x742   :  { %v1433_v40 = vmul.f32 %v1417_v26, %v1372_v12  ;;  %v1434_v42 = vmul.f32 %v1418_v52, %v1373_v55  ;;  %v1435_v28 = vmul.f32 %v1419_v27, %v1374_v16  ;;  %v1436_v21 = vmul.f32 %v1420_v25, %v1375_v56 }
 0x743   :  { %v1437_v45 = vmul.f32 %v1421_v30, %v1376_v13  ;;  %v1438_v47 = vmul.f32 %v1422_v31, %v1377_v17  ;;  %v1439_v51 = vmul.f32 %v1423_v32, %v1378_v33  ;;  %v1446_v38 = vmul.f32 %v2156_v24, %v1432_v34 }
 0x744   :  { %v1447_v36 = vmul.f32 %v2156_v24, %v1433_v40  ;;  %v1448_v44 = vmul.f32 %v2156_v24, %v1434_v42  ;;  %v1449_v58 = vmul.f32 %v2156_v24, %v1435_v28  ;;  %v1450_v59 = vmul.f32 %v2156_v24, %v1436_v21  ;;  %v2370_v40 = vld [vmem:[%s3489_s17 + $0x8] sm:$0xff]   ;;  %v2371_v42 = vld [vmem:[%s3489_s17 + $0x10] sm:$0xff]   ;;  %v2372_v28 = vld [vmem:[%s3489_s17 + $0x18] sm:$0xff]  }
 0x745   :  { %v1451_v39 = vmul.f32 %v2156_v24, %v1437_v45  ;;  %v1452_v62 = vmul.f32 %v2156_v24, %v1438_v47  ;;  %v1453_v29 = vmul.f32 %v2156_v24, %v1439_v51  ;;  %v1460_v53 = vadd.f32 %v2157_v35, %v1446_v38  ;;  %v2373_v21 = vld [vmem:[%s3489_s17 + $0x20] sm:$0xff]   ;;  %v2374_v45 = vld [vmem:[%s3489_s17 + $0x28] sm:$0xff]   ;;  %v2375_v47 = vld [vmem:[%s3489_s17 + $0x30] sm:$0xff]  }
 0x746   :  { %v1461_v63 = vadd.f32 %v2157_v35, %v1447_v36  ;;  %v1462_v0 = vadd.f32 %v2157_v35, %v1448_v44  ;;  %v1463_v54 = vadd.f32 %v2157_v35, %v1449_v58  ;;  %v1464_v1 = vadd.f32 %v2157_v35, %v1450_v59  ;;  %v2376_v51 = vld [vmem:[%s3489_s17 + $0x38] sm:$0xff]   ;;  %v2158_v38 = vld [vmem:[%s3488_s16] ss:$0 sm:$0xff] }
 0x747   :  { %v1465_v12 = vadd.f32 %v2157_v35, %v1451_v39  ;;  %v1466_v55 = vadd.f32 %v2157_v35, %v1452_v62  ;;  %v1467_v16 = vadd.f32 %v2157_v35, %v1453_v29  ;;  %v1468_v56 = vpack.c.bf16 %v1460_v53, %v1460_v53  ;;  %v2369_v35 = vld [vmem:[%s3489_s17] sm:$0xff]  }
 0x748   :  { %v1469_v13 = vpack.c.bf16 %v1461_v63, %v1461_v63  ;;  %v1470_v17 = vpack.c.bf16 %v1462_v0, %v1462_v0  ;;  %v1471_v33 = vpack.c.bf16 %v1463_v54, %v1463_v54  ;;  %v1472_v2 = vpack.c.bf16 %v1464_v1, %v1464_v1  ;;  %2303 = vmatpush3.bf16.msra.mxu1 %v2369_v35 }
 0x749   :  { %v1473_v57 = vpack.c.bf16 %v1465_v12, %v1465_v12  ;;  %v1474_v48 = vpack.c.bf16 %v1466_v55, %v1466_v55  ;;  %v1475_v3 = vpack.c.bf16 %v1467_v16, %v1467_v16  ;;  %v1495_v37 = vunpack.c.l.b16 %v1468_v56  ;;  %2304 = vmatprep.subr.bf16.mxu1 %v2726_v60 }
 0x74a   :  { %v1496_v4 = vunpack.c.l.b16 %v1469_v13  ;;  %v1497_v61 = vunpack.c.l.b16 %v1470_v17  ;;  %v1498_v20 = vunpack.c.l.b16 %v1471_v33  ;;  %v1499_v5 = vunpack.c.l.b16 %v1472_v2 }
 0x74b   :  { %v1500_v41 = vunpack.c.l.b16 %v1473_v57  ;;  %v1501_v49 = vunpack.c.l.b16 %v1474_v48  ;;  %v1502_v15 = vunpack.c.l.b16 %v1475_v3 }
 0x74c   :  { %v1503_v6 = vrot.slane %v1496_v4, 7  ;;  %v1505_v8 = vrot.slane %v1497_v61, 6  ;;  %v1507_v50 = vrot.slane %v1498_v20, 5  ;;  %v1509_v23 = vrot.slane %v1499_v5, 4  ;;  %2305 = vmatpush3.bf16.msra.mxu1 %v2370_v40 }
 0x74d   :  { %v1511_v26 = vrot.slane %v1500_v41, 3  ;;  %v1513_v27 = vrot.slane %v1501_v49, 2  ;;  %v1515_v30 = vrot.slane %v1502_v15, 1  ;;  %2306 = vmatprep.subr.bf16.mxu1 %v2726_v60 }
 0x74e   :  { %v1504_v22 = vsel %vm590_vm1, %v1503_v6, %v1495_v37 }
 0x74f   :  { %v1506_v19 = vsel %vm593_vm2, %v1505_v8, %v1504_v22  ;;  %v2162_v8 = vld [vmem:[%s3490_s18] ss:$0 sm:$0xff] }
 0x750   :  { %v1508_v24 = vsel %vm596_vm3, %v1507_v50, %v1506_v19  ;;  %2307 = vmatpush3.bf16.msra.mxu1 %v2371_v42 }
 0x751   :  { %v1510_v52 = vsel %vm599_vm4, %v1509_v23, %v1508_v24  ;;  %2308 = vmatprep.subr.bf16.mxu1 %v2726_v60 }
 0x752   :  { %v1512_v25 = vsel %vm602_vm5, %v1511_v26, %v1510_v52 }
 0x753   :  { %v1514_v31 = vsel %vm605_vm6, %v1513_v27, %v1512_v25 }
 0x754   :  { %v1516_v32 = vsel %vm608_vm7, %v1515_v30, %v1514_v31  ;;  %2309 = vmatpush3.bf16.msra.mxu1 %v2372_v28 }
 0x755   :  { %v1517_v34 = vpack.c.b16 %v1516_v32, %v1516_v32  ;;  %2310 = vmatprep.subr.bf16.mxu1 %v2726_v60 }
 0x757   :  { %2299 = vmatmul.mubr.msk.bf16.vlgmr.msra.gmra.mrb[24].mxu0 %vm196_vm0, %v1517_v34 }
 0x758   :  { %2330 = vmatprep.mubr.msk.f32.mxu0 %vm2727_vm8, %v2726_v60  ;;  %2311 = vmatpush3.bf16.msra.mxu1 %v2373_v21 }
 0x759   :  { %2312 = vmatprep.subr.bf16.mxu1 %v2726_v60 }
 0x75c   :  { %2313 = vmatpush3.bf16.msra.mxu1 %v2374_v45 }
 0x75d   :  { %2314 = vmatprep.subr.bf16.mxu1 %v2726_v60 }
 0x760   :  { %2315 = vmatpush3.bf16.msra.mxu1 %v2375_v47 }
 0x761   :  { %2316 = vmatprep.subr.bf16.mxu1 %v2726_v60 }
 0x764   :  { %2317 = vmatpush3.bf16.msra.mxu1 %v2376_v51 }
 0x82a   :  { %v1567_v36 = vpop.f32.mrb[24].mxu0 }
 0x82b   :  { %v1568_v44 = vadd.f32 %v2158_v38, %v1567_v36  ;;  %v2300_v58 = vpop.f32.mrb[25].mxu0 }
 0x82c   :  { %v1570_v59 = vpop.f32.mrb[26].mxu0 }
 0x82d   :  { %v1574_v39 = vmul.f32 0.70710677, %v1568_v44  ;;  %v2301_v62 = vpop.f32.mrb[27].mxu0  ;;  %v1573_v5 = vmul.f32 0.5, %v1568_v44 }
 0x82f   :  { %v1575_v29 = vand.u32 2147483647, %v1574_v39  ;;  %vm1595_vm11 = vcmp.ge.f32.partialorder %v1574_v39, 0.0 }
 0x831   :  { %v1576_v53 = vmul.f32 0.3275911, %v1575_v29  ;;  %v1589_v60 = vsub.f32 0.0, %v1575_v29 }
 0x833   :  { %v1577_v63 = vadd.f32 1.0, %v1576_v53  ;;  %v1590_v54 = vmul.f32 %v1589_v60, %v1575_v29 }
 0x835   :  { %2427 = vrcp.f32 %v1577_v63  ;;  %v1591_v55 = vmul.f32 1.442695, %v1590_v54 }
 0x837   :  { %2429 = vpow2.f32 %v1591_v55 }
 0x83f   :  { %v2428_v0 = vpop.eup %2427 }
 0x840   :  { %v1580_v1 = vmul.f32 1.0614054, %v2428_v0 }
 0x841   :  { %v2430_v48 = vpop.eup %2429 }
 0x842   :  { %v1581_v12 = vadd.f32 -1.4531521, %v1580_v1 }
 0x844   :  { %v1582_v16 = vmul.f32 %v2428_v0, %v1581_v12 }
 0x846   :  { %v1583_v56 = vadd.f32 1.4214138, %v1582_v16 }
 0x848   :  { %v1584_v13 = vmul.f32 %v2428_v0, %v1583_v56 }
 0x84a   :  { %v1585_v17 = vadd.f32 -0.28449672, %v1584_v13 }
 0x84c   :  { %v1586_v33 = vmul.f32 %v2428_v0, %v1585_v17 }
 0x84e   :  { %v1587_v2 = vadd.f32 0.2548296, %v1586_v33 }
 0x850   :  { %v1588_v57 = vmul.f32 %v2428_v0, %v1587_v2 }
 0x852   :  { %v1593_v3 = vmul.f32 %v2430_v48, %v1588_v57 }
 0x854   :  { %v1594_v4 = vsub.f32 1.0, %v1593_v3 }
 0x856   :  { %v1596_v61 = vsub.f32 0.0, %v1594_v4 }
 0x858   :  { %v1597_v20 = vsel %vm1595_vm11, %v1594_v4, %v1596_v61 }
 0x859   :  { %v1598_v37 = vadd.f32 1.0, %v1597_v20 }
 0x85b   :  { %v1599_v41 = vmul.f32 %v1598_v37, %v1573_v5 }
 0x85d   :  { %v1600_v6 = vpack.c.bf16 %v1599_v41, %v1599_v41 }
 0x85f   :  { %2319 = vmatmul.mubr.bf16.vlgmr.msra.gmra.mrb[16].mxu1 %v1600_v6 }
 0x932   :  { %v1706_v49 = vpop.f32.mrb[16].mxu1 }
 0x933   :  { %v1707_v15 = vadd.f32 %v2162_v8, %v1706_v49  ;;  %v2320_v22 = vpop.f32.mrb[17].mxu1 }
 0x934   :  { %v1709_v50 = vpop.f32.mrb[18].mxu1 }
 0x935   :  { %v2321_v19 = vpop.f32.mrb[19].mxu1  ;;  %v1713_v23 = vrot.slane %v1707_v15, 1  ;;  %v1714_v24 = vrot.slane %v1707_v15, 2  ;;  %v1715_v26 = vrot.slane %v1707_v15, 3  ;;  %v1716_v52 = vrot.slane %v1707_v15, 4 }
 0x936   :  { %v1717_v27 = vrot.slane %v1707_v15, 5  ;;  %v1718_v25 = vrot.slane %v1707_v15, 6  ;;  %v1719_v30 = vrot.slane %v1707_v15, 7  ;;  %v1728_v40 = vadd.f32 %v1707_v15, %v3234_v14 }
 0x937   :  { %v1729_v31 = vadd.f32 %v1713_v23, %v3223_v43  ;;  %v1730_v32 = vadd.f32 %v1714_v24, %v3228_v9  ;;  %v1731_v34 = vadd.f32 %v1715_v26, %v3230_v10  ;;  %v1732_v35 = vadd.f32 %v1716_v52, %v3232_v11 }
 0x938   :  { %v1733_v42 = vadd.f32 %v1717_v27, %v3236_v7  ;;  %v1734_v45 = vadd.f32 %v1718_v25, %v3240_v46  ;;  %v1735_v47 = vadd.f32 %v1719_v30, %v3242_v18 }
 0x939   :  { %v1746_v28 = vrot.slane %v1729_v31, 7  ;;  %v1748_v21 = vrot.slane %v1730_v32, 6  ;;  %v1750_v38 = vrot.slane %v1731_v34, 5  ;;  %v1752_v9 = vrot.slane %v1732_v35, 4 }
 0x93a   :  { %v1754_v36 = vrot.slane %v1733_v42, 3  ;;  %v1756_v14 = vrot.slane %v1734_v45, 2  ;;  %v1758_v44 = vrot.slane %v1735_v47, 1 }
 0x93b   :  { %v1747_v51 = vsel %vm590_vm1, %v1746_v28, %v1728_v40 }
 0x93c   :  { %v1749_v43 = vsel %vm593_vm2, %v1748_v21, %v1747_v51 }
 0x93d   :  { %v1751_v10 = vsel %vm596_vm3, %v1750_v38, %v1749_v43  ;;  %v2172_v43 = vld [vmem:[%s3492_s20] ss:$0 sm:$0xff] }
 0x93e   :  { %v1753_v11 = vsel %vm599_vm4, %v1752_v9, %v1751_v10 }
 0x93f   :  { %v1755_v7 = vsel %vm602_vm5, %v1754_v36, %v1753_v11 }
 0x940   :  { %v1757_v58 = vsel %vm605_vm6, %v1756_v14, %v1755_v7 }
 0x941   :  { %v1759_v46 = vsel %vm608_vm7, %v1758_v44, %v1757_v58 }
 0x942   :  { %v1761_v18 = vsel %vm196_vm0, %v1759_v46, 0.0 }
 0x943   :  { %1762 = vadd.xlane.f32.xlu0 %v1761_v18 }
 0x9d0   :  { %v1763_v59 = vpop.xlane.xlu0 %1762 }
 0x9d1   :  { %v1764_v39 = vmul.f32 0.03125, %v1763_v59 }
 0x9d3   :  { %v1766_v62 = vrot.slane %v1764_v39, 1  ;;  %v1767_v29 = vrot.slane %v1764_v39, 2  ;;  %v1768_v53 = vrot.slane %v1764_v39, 3  ;;  %v1769_v63 = vrot.slane %v1764_v39, 4 }
 0x9d4   :  { %v1770_v60 = vrot.slane %v1764_v39, 5  ;;  %v1771_v0 = vrot.slane %v1764_v39, 6  ;;  %v1772_v54 = vrot.slane %v1764_v39, 7  ;;  %v1781_v1 = vsub.f32 %v1728_v40, %v1764_v39 }
 0x9d5   :  { %v1782_v12 = vsub.f32 %v1729_v31, %v1766_v62  ;;  %v1783_v55 = vsub.f32 %v1730_v32, %v1767_v29  ;;  %v1784_v16 = vsub.f32 %v1731_v34, %v1768_v53  ;;  %v1785_v56 = vsub.f32 %v1732_v35, %v1769_v63  ;;  %v2171_v35 = vld [vmem:[%s3491_s19] ss:$0 sm:$0xff] }
 0x9d6   :  { %v1786_v13 = vsub.f32 %v1733_v42, %v1770_v60  ;;  %v1787_v17 = vsub.f32 %v1734_v45, %v1771_v0  ;;  %v1788_v33 = vsub.f32 %v1735_v47, %v1772_v54  ;;  %v1789_v4 = vmul.f32 %v1781_v1, %v1781_v1 }
 0x9d7   :  { %v1790_v2 = vmul.f32 %v1782_v12, %v1782_v12  ;;  %v1791_v57 = vmul.f32 %v1783_v55, %v1783_v55  ;;  %v1792_v48 = vmul.f32 %v1784_v16, %v1784_v16  ;;  %v1793_v3 = vmul.f32 %v1785_v56, %v1785_v56 }
 0x9d8   :  { %v1794_v61 = vmul.f32 %v1786_v13, %v1786_v13  ;;  %v1795_v37 = vmul.f32 %v1787_v17, %v1787_v17  ;;  %v1796_v41 = vmul.f32 %v1788_v33, %v1788_v33 }
 0x9d9   :  { %v1805_v20 = vrot.slane %v1790_v2, 7  ;;  %v1807_v5 = vrot.slane %v1791_v57, 6  ;;  %v1809_v8 = vrot.slane %v1792_v48, 5  ;;  %v1811_v15 = vrot.slane %v1793_v3, 4 }
 0x9da   :  { %v1813_v50 = vrot.slane %v1794_v61, 3  ;;  %v1815_v23 = vrot.slane %v1795_v37, 2  ;;  %v1817_v26 = vrot.slane %v1796_v41, 1 }
 0x9db   :  { %v1806_v6 = vsel %vm590_vm1, %v1805_v20, %v1789_v4 }
 0x9dc   :  { %v1808_v49 = vsel %vm593_vm2, %v1807_v5, %v1806_v6 }
 0x9dd   :  { %v1810_v22 = vsel %vm596_vm3, %v1809_v8, %v1808_v49 }
 0x9de   :  { %v1812_v19 = vsel %vm599_vm4, %v1811_v15, %v1810_v22 }
 0x9df   :  { %v1814_v24 = vsel %vm602_vm5, %v1813_v50, %v1812_v19 }
 0x9e0   :  { %v1816_v52 = vsel %vm605_vm6, %v1815_v23, %v1814_v24 }
 0x9e1   :  { %v1818_v27 = vsel %vm608_vm7, %v1817_v26, %v1816_v52 }
 0x9e2   :  { %v1820_v25 = vsel %vm196_vm0, %v1818_v27, 0.0 }
 0x9e3   :  { %1821 = vadd.xlane.f32.xlu1 %v1820_v25 }
 0xa70   :  { %v1822_v30 = vpop.xlane.xlu1 %1821 }
 0xa71   :  { %v1823_v31 = vmul.f32 0.03125, %v1822_v30 }
 0xa73   :  { %v1824_v32 = vadd.f32 1e-06, %v1823_v31 }
 0xa75   :  { %2431 = vrsqrt.f32 %v1824_v32 }
 0xa7f   :  { %v2432_v34 = vpop.eup %2431 }
 0xa80   :  { %v1827_v40 = vrot.slane %v2432_v34, 1  ;;  %v1828_v42 = vrot.slane %v2432_v34, 2  ;;  %v1829_v28 = vrot.slane %v2432_v34, 3  ;;  %v1830_v21 = vrot.slane %v2432_v34, 4 }
 0xa81   :  { %v1831_v45 = vrot.slane %v2432_v34, 5  ;;  %v1832_v47 = vrot.slane %v2432_v34, 6  ;;  %v1833_v51 = vrot.slane %v2432_v34, 7  ;;  %v1842_v38 = vmul.f32 %v2432_v34, %v1781_v1 }
 0xa82   :  { %v1843_v9 = vmul.f32 %v1827_v40, %v1782_v12  ;;  %v1844_v10 = vmul.f32 %v1828_v42, %v1783_v55  ;;  %v1845_v36 = vmul.f32 %v1829_v28, %v1784_v16  ;;  %v1846_v11 = vmul.f32 %v1830_v21, %v1785_v56 }
 0xa83   :  { %v1847_v14 = vmul.f32 %v1831_v45, %v1786_v13  ;;  %v1848_v7 = vmul.f32 %v1832_v47, %v1787_v17  ;;  %v1849_v44 = vmul.f32 %v1833_v51, %v1788_v33  ;;  %v1856_v58 = vmul.f32 %v2171_v35, %v1842_v38  ;;  %v1977_v51 = vld [vmem:[%s3525_s9] sm:$0xff]  ;;  %v1978_v38 = vld [vmem:[%s3525_s9 + $0x8] sm:$0xff] }
 0xa84   :  { %v1857_v46 = vmul.f32 %v2171_v35, %v1843_v9  ;;  %v1858_v18 = vmul.f32 %v2171_v35, %v1844_v10  ;;  %v1859_v59 = vmul.f32 %v2171_v35, %v1845_v36  ;;  %v1860_v39 = vmul.f32 %v2171_v35, %v1846_v11  ;;  %v1980_v36 = vld [vmem:[%s3525_s9 + $0x18] sm:$0xff] }
 0xa85   :  { %v1861_v62 = vmul.f32 %v2171_v35, %v1847_v14  ;;  %v1862_v29 = vmul.f32 %v2171_v35, %v1848_v7  ;;  %v1863_v53 = vmul.f32 %v2171_v35, %v1849_v44  ;;  %v3364_v63 = vadd.f32 %v2172_v43, %v1856_v58 }
 0xa86   :  { %v3366_v60 = vadd.f32 %v2172_v43, %v1857_v46  ;;  %v3368_v0 = vadd.f32 %v2172_v43, %v1858_v18  ;;  %v3370_v54 = vadd.f32 %v2172_v43, %v1859_v59  ;;  %v3372_v1 = vadd.f32 %v2172_v43, %v1860_v39 }
 0xa87   :  { %v3374_v12 = vadd.f32 %v2172_v43, %v1861_v62  ;;  %v3376_v55 = vadd.f32 %v2172_v43, %v1862_v29  ;;  %v3378_v16 = vadd.f32 %v2172_v43, %v1863_v53  ;;  %v1903_v57 = vmul.f32 %v3364_v63, %v3364_v63  ;;  %v1979_v43 = vld [vmem:[%s3525_s9 + $0x10] sm:$0xff] }
 0xa88   :  { %v1904_v56 = vmul.f32 %v3366_v60, %v3366_v60  ;;  %v1905_v13 = vmul.f32 %v3368_v0, %v3368_v0  ;;  %v1906_v17 = vmul.f32 %v3370_v54, %v3370_v54  ;;  %v1907_v33 = vmul.f32 %v3372_v1, %v3372_v1 }
 0xa89   :  { %v1886_v2 = vrot.slane %v3366_v60, 7  ;;  %v1908_v48 = vmul.f32 %v3374_v12, %v3374_v12  ;;  %v1909_v61 = vmul.f32 %v3376_v55, %v3376_v55  ;;  %v1910_v5 = vmul.f32 %v3378_v16, %v3378_v16 }
 0xa8a   :  { %v1919_v3 = vrot.slane %v1904_v56, 7  ;;  %v1921_v4 = vrot.slane %v1905_v13, 6  ;;  %v1923_v41 = vrot.slane %v1906_v17, 5  ;;  %v1888_v6 = vrot.slane %v3368_v0, 6 }
 0xa8b   :  { %v1887_v20 = vsel %vm590_vm1, %v1886_v2, %v3364_v63  ;;  %v1925_v49 = vrot.slane %v1907_v33, 4  ;;  %v1890_v15 = vrot.slane %v3370_v54, 5  ;;  %v1927_v50 = vrot.slane %v1908_v48, 3 }
 0xa8c   :  { %v1920_v37 = vsel %vm590_vm1, %v1919_v3, %v1903_v57  ;;  %v1889_v19 = vsel %vm593_vm2, %v1888_v6, %v1887_v20  ;;  %v1892_v23 = vrot.slane %v3372_v1, 4  ;;  %v1929_v26 = vrot.slane %v1909_v61, 2 }
 0xa8d   :  { %v1922_v8 = vsel %vm593_vm2, %v1921_v4, %v1920_v37  ;;  %v1891_v52 = vsel %vm596_vm3, %v1890_v15, %v1889_v19  ;;  %v1894_v27 = vrot.slane %v3374_v12, 3  ;;  %v1931_v30 = vrot.slane %v1910_v5, 1 }
 0xa8e   :  { %v1924_v22 = vsel %vm596_vm3, %v1923_v41, %v1922_v8  ;;  %v1893_v31 = vsel %vm599_vm4, %v1892_v23, %v1891_v52  ;;  %v1896_v32 = vrot.slane %v3376_v55, 2  ;;  %v1898_v40 = vrot.slane %v3378_v16, 1 }
 0xa8f   :  { %v1926_v24 = vsel %vm599_vm4, %v1925_v49, %v1924_v22  ;;  %v1895_v35 = vsel %vm602_vm5, %v1894_v27, %v1893_v31  ;;  %v2729_v9 = vmov 0.0|0.0   ;;  %v2334_v10 = vpack.c.bf16 %v1978_v38, %v1977_v51 }
 0xa90   :  { %v1928_v25 = vsel %vm602_vm5, %v1927_v50, %v1926_v24  ;;  %v1897_v28 = vsel %vm605_vm6, %v1896_v32, %v1895_v35  ;;  %2333 = vmatprep.subr.bf16.mxu0 %v2729_v9  ;;  %v2337_v11 = vpack.c.bf16 %v1980_v36, %v1979_v43 }
 0xa91   :  { %v1930_v34 = vsel %vm605_vm6, %v1929_v26, %v1928_v25  ;;  %v1899_v45 = vsel %vm608_vm7, %v1898_v40, %v1897_v28  ;;  %2335 = vmatpush3.bf16.msra.mxu0 %v2334_v10 }
 0xa92   :  { %v1932_v42 = vsel %vm608_vm7, %v1931_v30, %v1930_v34  ;;  %v1901_v47 = vsel %vm196_vm0, %v1899_v45, 0.0  ;;  %2336 = vmatprep.subr.bf16.mxu0 %v2729_v9 }
 0xa93   :  { %v1934_v21 = vsel %vm196_vm0, %v1932_v42, 0.0  ;;  %1902 = vst [vmem:[#allocation18] sm:$0xff] %v1901_v47 }
 0xa94   :  { %1935 = vadd.xlane.f32.xlu0 %v1934_v21 }
 0xa95   :  { %2338 = vmatpush3.bf16.msra.mxu0 %v2337_v11 }
 0xb21   :  { %v1936_v14 = vpop.xlane.xlu0 %1935 }
 0xb22   :  { %2433 = vrsqrt.f32 %v1936_v14  ;;  %vm1939_vm12 = vcmp.eq.f32.partialorder %v1936_v14, inf  ;;  %v1942_v58 = vand.u32 2147483648, %v1936_v14  ;;  %vm1941_vm13 = vcmp.eq.f32.partialorder %v1936_v14, 0.0 }
 0xb2c   :  { %v2434_v7 = vpop.eup %2433 }
 0xb2d   :  { %v1938_v44 = vmul.f32 %v2434_v7, %v1936_v14 }
 0xb2f   :  { %v1940_v46 = vsel %vm1939_vm12, %v1936_v14, %v1938_v44 }
 0xb30   :  { %v1943_v18 = vsel %vm1941_vm13, %v1942_v58, %v1940_v46 }
 0xb31   :  { %v1944_v59 = vadd.f32 1.0, %v1943_v18 }
 0xb33   :  { %v1946_v39 = vrot.slane %v1944_v59, 1  ;;  %v1947_v62 = vrot.slane %v1944_v59, 2  ;;  %v1948_v29 = vrot.slane %v1944_v59, 3  ;;  %v1949_v53 = vrot.slane %v1944_v59, 4 }
 0xb34   :  { %2435 = vrcp.f32 %v1944_v59  ;;  %v1950_v56 = vrot.slane %v1944_v59, 5  ;;  %v1951_v13 = vrot.slane %v1944_v59, 6  ;;  %v1952_v17 = vrot.slane %v1944_v59, 7 }
 0xb35   :  { %2437 = vrcp.f32 %v1946_v39 }
 0xb36   :  { %2439 = vrcp.f32 %v1947_v62 }
 0xb37   :  { %2441 = vrcp.f32 %v1948_v29 }
 0xb38   :  { %2443 = vrcp.f32 %v1949_v53 }
 0xb39   :  { %2445 = vrcp.f32 %v1950_v56 }
 0xb3a   :  { %2447 = vrcp.f32 %v1951_v13 }
 0xb3b   :  { %2449 = vrcp.f32 %v1952_v17 }
 0xb3e   :  { %v2436_v33 = vpop.eup %2435 }
 0xb3f   :  { %v2438_v2 = vpop.eup %2437  ;;  %v1962_v20 = vmul.f32 %v2436_v33, %v3364_v63 }
 0xb40   :  { %v2440_v57 = vpop.eup %2439  ;;  %v1964_v48 = vmul.f32 %v2438_v2, %v3366_v60 }
 0xb41   :  { %v2442_v3 = vpop.eup %2441  ;;  %v1966_v4 = vmul.f32 %v2440_v57, %v3368_v0 }
 0xb42   :  { %v2444_v61 = vpop.eup %2443  ;;  %v1968_v5 = vmul.f32 %v2442_v3, %v3370_v54  ;;  %v1989_v37 = vrot.slane %v1964_v48, 7 }
 0xb43   :  { %v2446_v41 = vpop.eup %2445  ;;  %v1970_v6 = vmul.f32 %v2444_v61, %v3372_v1  ;;  %v1991_v8 = vrot.slane %v1966_v4, 6 }
 0xb44   :  { %v2448_v49 = vpop.eup %2447  ;;  %v1972_v15 = vmul.f32 %v2446_v41, %v3374_v12  ;;  %v1990_v22 = vsel %vm590_vm1, %v1989_v37, %v1962_v20  ;;  %v1993_v50 = vrot.slane %v1968_v5, 5 }
 0xb45   :  { %v2450_v60 = vpop.eup %2449  ;;  %v1974_v19 = vmul.f32 %v2448_v49, %v3376_v55  ;;  %v1992_v0 = vsel %vm593_vm2, %v1991_v8, %v1990_v22  ;;  %v1995_v23 = vrot.slane %v1970_v6, 4 }
 0xb46   :  { %v1976_v63 = vmul.f32 %v2450_v60, %v3378_v16  ;;  %v1994_v54 = vsel %vm596_vm3, %v1993_v50, %v1992_v0  ;;  %v1997_v24 = vrot.slane %v1972_v15, 3 }
 0xb47   :  { %v1996_v1 = vsel %vm599_vm4, %v1995_v23, %v1994_v54  ;;  %v1999_v26 = vrot.slane %v1974_v19, 2 }
 0xb48   :  { %v1998_v52 = vsel %vm602_vm5, %v1997_v24, %v1996_v1  ;;  %v2001_v12 = vrot.slane %v1976_v63, 1 }
 0xb49   :  { %v2000_v27 = vsel %vm605_vm6, %v1999_v26, %v1998_v52 }
 0xb4a   :  { %v2002_v25 = vsel %vm608_vm7, %v2001_v12, %v2000_v27 }
 0xb4b   :  { %2331 = vmatmul.mubr.msk.f32.vlgmr.msra.gmra.mrb[28].mxu0 %vm196_vm0, %v2002_v25 }
 0xb4c   :  { %2668 = shalt.err (!%p2665_p6)
}
 0xb4d   :  { %s3526_s7 = sld [smem:[#allocation37_spill]] }
 0xb53   :  { %s2669_s26 = scalar_lea.hbm %s3526_s7, 128 }
 0xb54   :  { %p2670_p7 = scmp.ne.s32.totalorder %s3526_s7, %s2669_s26  ;;  %p2673_p8 = scmp.lt.u32.totalorder %s2669_s26, %s3526_s7 }
 0xb56   :  { %p2675_p9 = pnand %p2673_p8, %p2670_p7 }
 0xb58   :  { %2678 = shalt.err (!%p2675_p9)
}
 0xb59   :  { %2096 = dma.vmem_to_hbm [thread:$0]  %s2094_s30, 128, %s3526_s7, [#allocation19]  }
 0xb5a   :  { %s2731_s8 = smov [#allocation17]  }
 0xb5b   :  { %s2083_s22 = sshll.u32 %s2731_s8, 4  ;;  %s2084_s22 = int_to_ptr.vmem [resolvable:$true] %s2083_s22 }
 0xb5c   :  { %s2679_s10 = scalar_lea.vmem %s2084_s22, 128  ;;  %p2684_p11 = scmp.lt.s32.totalorder %s2084_s22, %s2084_s22 }
 0xb5d   :  { %p2680_p10 = scmp.ne.s32.totalorder %s2084_s22, %s2679_s10  ;;  %p2685_p12 = scmp.lt.s32.totalorder %s2679_s10, %s2679_s10 }
 0xb5f   :  { %p2686_p13 = por %p2685_p12, %p2684_p11 }
 0xb61   :  { %p2687_p0 = pnand %p2686_p13, %p2680_p10 }
 0xc1e   :  { %v2071_v55 = vpop.f32.mrb[28].mxu0 }
 0xc1f   :  { %v2075_v16 = vmul.f32 30.0, %v2071_v55  ;;  %v2332_v30 = vpop.f32.mrb[29].mxu0 }
 0xc21   :  { %2076 = vst [vmem:[#allocation17] sm:$0xff] %v2075_v16 }
 0xc22   :  { %2690 = shalt.err (!%p2687_p0)
}
 0xc23   :  { %s3527_s18 = sld [smem:[#allocation36_spill]] }
 0xc29   :  { %s2691_s2 = scalar_lea.hbm %s3527_s18, 128 }
 0xc2a   :  { %p2692_p1 = scmp.ne.s32.totalorder %s3527_s18, %s2691_s2  ;;  %p2695_p2 = scmp.lt.u32.totalorder %s2691_s2, %s3527_s18 }
 0xc2c   :  { %p2697_p3 = pnand %p2695_p2, %p2692_p1 }
 0xc2e   :  { %2700 = shalt.err (!%p2697_p3)
}
 0xc2f   :  { %2086 = dma.vmem_to_hbm [thread:$0]  %s2084_s22, 128, %s3527_s18, [#allocation4]  }
 0xc30   :  { %2711 = dma.done.wait [#allocation4], 128  }
 0xc31   :  { %2712 = vsyncadd [#allocation4], 4294967168 }
 0xc32   :  { %2713 = dma.done.wait [#allocation19], 128  }
 0xc33   :  { %2714 = vsyncadd [#allocation19], 4294967168 }
 0xc34   :  { %2103 = vsyncpa [#allocation3], 1 }
 0xc35   :  { %2104 = vsyncpa [#allocation6], 1 }
 0xc36   :  { %2105 = vsyncpa [#allocation9], 1 }
 0xc37   :  { %2106 = vsyncpa [#allocation12], 1 }
 0xc38   :  { %2107 = vsyncpa [#allocation15], 1 }
 0xc39   :  { %2108 = vsyncpa [#allocation4], 1 }
 0xc3a   :  { %2109 = vsyncpa [#allocation19], 1 }

</bundles_post_ra>
